<compile_context>
chip_gen: v6e
topology: v6e:2x2x1
jax: 0.10.0
libtpu: 0.0.40
codegen_flags: <defaults>
</compile_context>

<pallas_src>
import functools

import numpy as np
import jax
import jax.numpy as jnp
from jax.experimental import pallas as pl
from jax.experimental.pallas import tpu as pltpu

OUT_H = 224
OUT_W = 224

CLIP_MEAN = np.array([0.48145466, 0.4578275, 0.40821073], dtype=np.float32)
CLIP_STD = np.array([0.26862954, 0.26130258, 0.27577711], dtype=np.float32)


def _bilinear_matrix(in_size: int, out_size: int) -> np.ndarray:
    """Interpolation matrix M (out_size, in_size) matching PyTorch
    F.interpolate(..., mode='bilinear', align_corners=False)."""
    scale = in_size / out_size
    src = (np.arange(out_size, dtype=np.float64) + 0.5) * scale - 0.5
    src = np.maximum(src, 0.0)                       # PyTorch clamps negative coords
    x0 = np.floor(src).astype(np.int64)
    x0 = np.minimum(x0, in_size - 1)
    x1 = np.minimum(x0 + 1, in_size - 1)
    w1 = src - np.floor(src)
    w0 = 1.0 - w1
    m = np.zeros((out_size, in_size), dtype=np.float32)
    rows = np.arange(out_size)
    np.add.at(m, (rows, x0), w0.astype(np.float32))
    np.add.at(m, (rows, x1), w1.astype(np.float32))
    return m


def _preprocess_kernel(x_ref, wxt_ref, wy_ref, o_ref, acc_ref, *,
                       num_k, needs_mask, h_in, h_rows, scale, bias):
    # x_ref  : (3, h_rows, W_in)  input dtype (cast to bf16 in-kernel)
    # wxt_ref: (W_in, 224)        bf16
    # wy_ref : (224, h_rows)      f32 (shared across channels, zero-padded cols)
    # o_ref  : (3, 224, 224)      out dtype
    # acc_ref: (3, 224, 224)      f32 scratch (used only when num_k > 1)
    k = pl.program_id(1)

    wxt = wxt_ref[...]           # shared MXU RHS for all 3 channels
    wy = wy_ref[...]             # shared (not scale-folded -> exact f32 height pass)

    if needs_mask:
        # Last H chunk may extend past H_in; rows DMA'd from out of bounds are
        # undefined, so zero them before they enter the height-pass reduction.
        valid = h_in - k * h_rows
        row_ok = jax.lax.broadcasted_iota(jnp.int32, (h_rows, OUT_W), 0) < valid

    def resize_chunk(ch):
        # Width pass: bf16 x @ bf16 WxT with f32 accumulation -> (h_rows, 224)
        tmp = jnp.dot(x_ref[ch].astype(jnp.bfloat16), wxt,
                      preferred_element_type=jnp.float32)
        if needs_mask:
            tmp = jnp.where(row_ok, tmp, 0.0)
        # Height pass: exact f32 -> (224, 224)
        return jnp.dot(wy, tmp, preferred_element_type=jnp.float32)

    def normalize(v, ch):
        # Exact CLIP normalization in f32 epilogue (constants baked in).
        return (v * scale[ch] + bias[ch]).astype(o_ref.dtype)

    if num_k == 1:
        # Single-chunk fast path: no accumulator round trip.
        for ch in range(3):
            o_ref[ch] = normalize(resize_chunk(ch), ch)
    else:
        @pl.when(k == 0)
        def _init():
            acc_ref[...] = jnp.zeros_like(acc_ref)

        for ch in range(3):
            acc_ref[ch] += resize_chunk(ch)

        @pl.when(k == num_k - 1)
        def _finalize():
            for ch in range(3):
                o_ref[ch] = normalize(acc_ref[ch], ch)


def _pick_vmem_limit(per_step_bytes: int):
    """Scoped-VMEM request: margin over the pipeline footprint, capped at
    ~85% of physical VMEM (headroom for compiler internal scratch)."""
    try:
        cap = int(pltpu.get_tpu_info().vmem_capacity_bytes)
    except Exception:
        cap = 64 << 20            # conservative fallback (v7x per-core VMEM)
    cap = int(cap * 0.85)
    need = int(per_step_bytes * 1.25)
    if need <= (12 << 20):        # comfortably inside the default scoped limit
        return None
    return min(need, cap)


def preprocess(x: jax.Array, *, h_chunk: int = 256, out_dtype=None) -> jax.Array:
    """x: float NCHW array with C == 3. Returns (N, 3, 224, 224) in out_dtype
    (defaults to x.dtype, matching the PyTorch module)."""
    n, c, h_in, w_in = x.shape
    assert c == 3, "Preprocess expects 3 input channels"
    out_dtype = x.dtype if out_dtype is None else jnp.dtype(out_dtype)

    if h_in <= h_chunk:
        h_rows, num_k = h_in, 1                 # single chunk, full rows
    else:
        assert h_chunk % 128 == 0, "h_chunk must be a multiple of 128"
        h_rows = h_chunk
        num_k = pl.cdiv(h_in, h_rows)
    h_pad = h_rows * num_k
    needs_mask = h_pad != h_in

    # Host-built resize matrices (small constants).
    wy_np = _bilinear_matrix(h_in, OUT_H)                               # (224, H_in)
    if h_pad != h_in:
        wy_np = np.pad(wy_np, ((0, 0), (0, h_pad - h_in)))              # zero cols
    wy = jnp.asarray(wy_np, dtype=jnp.float32)                          # (224, H_pad)
    wxt = jnp.asarray(_bilinear_matrix(w_in, OUT_W).T,
                      dtype=jnp.bfloat16)                               # (W_in, 224)

    scale = tuple(float(v) for v in (1.0 / CLIP_STD))                   # exact f32
    bias = tuple(float(v) for v in (-CLIP_MEAN / CLIP_STD))

    kernel = functools.partial(
        _preprocess_kernel, num_k=num_k, needs_mask=needs_mask,
        h_in=h_in, h_rows=h_rows, scale=scale, bias=bias)

    # ---- VMEM footprint estimate (double-buffered operands + f32 accumulator)
    x_blk = 3 * h_rows * w_in * x.dtype.itemsize
    wxt_blk = w_in * OUT_W * 2
    wy_blk = OUT_H * h_rows * 4
    out_blk = 3 * OUT_H * OUT_W * out_dtype.itemsize
    per_step = 2 * (x_blk + wxt_blk + wy_blk + out_blk) + 3 * OUT_H * OUT_W * 4
    vmem_limit = _pick_vmem_limit(per_step)

    # ---- advisory cost estimate for the XLA scheduler
    flops = n * 3 * (2 * h_in * w_in * OUT_W + 2 * OUT_H * h_pad * OUT_W)
    bytes_accessed = (n * 3 * h_in * w_in * x.dtype.itemsize   # x read once
                      + w_in * OUT_W * 2                       # WxT
                      + OUT_H * h_pad * 4                      # Wy
                      + n * out_blk)                           # output

    return pl.pallas_call(
        kernel,
        out_shape=jax.ShapeDtypeStruct((n, 3, OUT_H, OUT_W), out_dtype),
        grid=(n, num_k),
        in_specs=[
            # x chunk: (3, h_rows, W_in) — fetched exactly once per (image, chunk)
            pl.BlockSpec((None, 3, h_rows, w_in), lambda i, k: (i, 0, k, 0)),
            # WxT: constant block (never re-fetched across steps)
            pl.BlockSpec((w_in, OUT_W), lambda i, k: (0, 0)),
            # Wy: per-chunk column block of the (zero-padded) height matrix
            pl.BlockSpec((OUT_H, h_rows), lambda i, k: (0, k)),
        ],
        out_specs=pl.BlockSpec((None, 3, OUT_H, OUT_W), lambda i, k: (i, 0, 0, 0)),
        scratch_shapes=[pltpu.VMEM((3, OUT_H, OUT_W), jnp.float32)],
        compiler_params=pltpu.CompilerParams(
            dimension_semantics=("parallel", "arbitrary"),
            vmem_limit_bytes=vmem_limit),
        cost_estimate=pl.CostEstimate(flops=int(flops), transcendentals=0,
                                      bytes_accessed=int(bytes_accessed)),
    )(x, wxt, wy)


def _preprocess_ref(x: jax.Array) -> jax.Array:
    """Pure-JAX f32 reference (exact f32 matmuls)."""
    n, c, h_in, w_in = x.shape
    wy = jnp.asarray(_bilinear_matrix(h_in, OUT_H))
    wx = jnp.asarray(_bilinear_matrix(w_in, OUT_W))
    resized = jnp.einsum("oh,nchw,pw->ncop", wy, x, wx,
                         precision=jax.lax.Precision.HIGHEST)
    mean = jnp.asarray(CLIP_MEAN).reshape(1, 3, 1, 1)
    std = jnp.asarray(CLIP_STD).reshape(1, 3, 1, 1)
    return (resized - mean) / std


if __name__ == "__main__":
    key = jax.random.PRNGKey(0)
    k1, k2 = jax.random.split(key)

    # 1) Small shape (module-consistent): single-chunk fast path.
    x = jax.random.uniform(k1, (2, 3, 16, 16), dtype=jnp.float32)
    out = jax.block_until_ready(preprocess(x))
    ref = _preprocess_ref(x)
    assert out.shape == (2, 3, 224, 224)
    assert out.dtype == jnp.float32
    err = np.abs(np.asarray(out, dtype=np.float32) - np.asarray(ref))
    # bf16 x / WxT (f32 accumulation, exact f32 height pass + normalization)
    assert err.max() < 1e-1, f"max abs err {err.max()}"
    assert err.mean() < 1e-2, f"mean abs err {err.mean()}"

    # 2) Exercise the chunked H_in reduction path (accumulator + boundary mask):
    #    H=300 with h_chunk=128 -> 3 chunks, last one partially out of bounds.
    x2 = jax.random.uniform(k2, (1, 3, 300, 40), dtype=jnp.float32)
    out2 = jax.block_until_ready(preprocess(x2, h_chunk=128))
    ref2 = _preprocess_ref(x2)
    err2 = np.abs(np.asarray(out2, dtype=np.float32) - np.asarray(ref2))
    assert err2.max() < 1e-1, f"chunked max abs err {err2.max()}"
    assert err2.mean() < 1e-2, f"chunked mean abs err {err2.mean()}"

    print("KERNEL_OK")
</pallas_src>

<mosaic_0001>
module attributes {stable_mosaic.version = 11 : i64} {
  func.func @_preprocess_kernel(%arg0: i32, %arg1: i32, %arg2: memref<1x3x16x16xf32, #tpu.memory_space<vmem>>, %arg3: memref<16x224xbf16, #tpu.memory_space<vmem>>, %arg4: memref<224x16xf32, #tpu.memory_space<vmem>>, %arg5: memref<1x3x224x224xf32, #tpu.memory_space<vmem>>, %arg6: memref<3x224x224xf32, #tpu.memory_space<vmem>>) attributes {dimension_semantics = [#tpu.dimension_semantics<parallel>, #tpu.dimension_semantics<arbitrary>], iteration_bounds = array<i64: 2, 1>, scalar_prefetch = 0 : i64, scratch_operands = 1 : i64, tpu.core_type = #tpu.core_type<tc>, window_params = [{transform_indices = @transform_0, window_bounds = array<i64: 1, 3, 16, 16>}, {pipeline_mode = #tpu.pipeline_mode<synchronous>, transform_indices = @transform_1, window_bounds = array<i64: 16, 224>}, {transform_indices = @transform_2, window_bounds = array<i64: 224, 16>}, {transform_indices = @transform_3, window_bounds = array<i64: 1, 3, 224, 224>}]} {
    %c0 = arith.constant 0 : index
    %c0_0 = arith.constant 0 : index
    %0 = vector.load %arg3[%c0, %c0_0] : memref<16x224xbf16, #tpu.memory_space<vmem>>, vector<16x224xbf16>
    %c0_1 = arith.constant 0 : index
    %c0_2 = arith.constant 0 : index
    %1 = vector.load %arg4[%c0_1, %c0_2] : memref<224x16xf32, #tpu.memory_space<vmem>>, vector<224x16xf32>
    %c0_3 = arith.constant 0 : index
    %c0_4 = arith.constant 0 : index
    %c0_5 = arith.constant 0 : index
    %c0_6 = arith.constant 0 : index
    %2 = vector.load %arg2[%c0_3, %c0_4, %c0_5, %c0_6] : memref<1x3x16x16xf32, #tpu.memory_space<vmem>>, vector<1x1x16x16xf32>
    %3 = vector.shape_cast %2 : vector<1x1x16x16xf32> to vector<16x16xf32>
    %4 = arith.truncf %3 : vector<16x16xf32> to vector<16x16xbf16>
    %cst = arith.constant dense<0.000000e+00> : vector<16x224xf32>
    %5 = tpu.matmul %4, %0, %cst {dimension_numbers = #tpu.dot_dimension_numbers<[1], [0], [0], [1], [0, 0, 1, 1], [], []>} : vector<16x16xbf16>, vector<16x224xbf16>, vector<16x224xf32> -> vector<16x224xf32>
    %cst_7 = arith.constant dense<0.000000e+00> : vector<224x224xf32>
    %6 = tpu.matmul %1, %5, %cst_7 {dimension_numbers = #tpu.dot_dimension_numbers<[1], [0], [0], [1], [0, 0, 1, 1], [], []>} : vector<224x16xf32>, vector<16x224xf32>, vector<224x224xf32> -> vector<224x224xf32>
    %cst_8 = arith.constant 3.72259855 : f32
    %7 = vector.broadcast %cst_8 : f32 to vector<224x224xf32>
    %8 = arith.mulf %6, %7 : vector<224x224xf32>
    %cst_9 = arith.constant -1.79226255 : f32
    %9 = vector.broadcast %cst_9 : f32 to vector<224x224xf32>
    %10 = arith.addf %8, %9 : vector<224x224xf32>
    %c0_10 = arith.constant 0 : index
    %c0_11 = arith.constant 0 : index
    %c0_12 = arith.constant 0 : index
    %c0_13 = arith.constant 0 : index
    %11 = vector.load %arg5[%c0_10, %c0_11, %c0_12, %c0_13] : memref<1x3x224x224xf32, #tpu.memory_space<vmem>>, vector<1x1x224x224xf32>
    %12 = vector.shape_cast %11 : vector<1x1x224x224xf32> to vector<224x224xf32>
    %13 = vector.shape_cast %10 : vector<224x224xf32> to vector<1x1x224x224xf32>
    tpu.vector_store %arg5[%c0_10, %c0_11, %c0_12, %c0_13], %13 {strides = array<i32>} : memref<1x3x224x224xf32, #tpu.memory_space<vmem>>, vector<1x1x224x224xf32>,
    %c0_14 = arith.constant 0 : index
    %c1 = arith.constant 1 : index
    %c0_15 = arith.constant 0 : index
    %c0_16 = arith.constant 0 : index
    %14 = vector.load %arg2[%c0_14, %c1, %c0_15, %c0_16] : memref<1x3x16x16xf32, #tpu.memory_space<vmem>>, vector<1x1x16x16xf32>
    %15 = vector.shape_cast %14 : vector<1x1x16x16xf32> to vector<16x16xf32>
    %16 = arith.truncf %15 : vector<16x16xf32> to vector<16x16xbf16>
    %cst_17 = arith.constant dense<0.000000e+00> : vector<16x224xf32>
    %17 = tpu.matmul %16, %0, %cst_17 {dimension_numbers = #tpu.dot_dimension_numbers<[1], [0], [0], [1], [0, 0, 1, 1], [], []>} : vector<16x16xbf16>, vector<16x224xbf16>, vector<16x224xf32> -> vector<16x224xf32>
    %cst_18 = arith.constant dense<0.000000e+00> : vector<224x224xf32>
    %18 = tpu.matmul %1, %17, %cst_18 {dimension_numbers = #tpu.dot_dimension_numbers<[1], [0], [0], [1], [0, 0, 1, 1], [], []>} : vector<224x16xf32>, vector<16x224xf32>, vector<224x224xf32> -> vector<224x224xf32>
    %cst_19 = arith.constant 3.82698083 : f32
    %19 = vector.broadcast %cst_19 : f32 to vector<224x224xf32>
    %20 = arith.mulf %18, %19 : vector<224x224xf32>
    %cst_20 = arith.constant -1.75209713 : f32
    %21 = vector.broadcast %cst_20 : f32 to vector<224x224xf32>
    %22 = arith.addf %20, %21 : vector<224x224xf32>
    %c0_21 = arith.constant 0 : index
    %c1_22 = arith.constant 1 : index
    %c0_23 = arith.constant 0 : index
    %c0_24 = arith.constant 0 : index
    %23 = vector.load %arg5[%c0_21, %c1_22, %c0_23, %c0_24] : memref<1x3x224x224xf32, #tpu.memory_space<vmem>>, vector<1x1x224x224xf32>
    %24 = vector.shape_cast %23 : vector<1x1x224x224xf32> to vector<224x224xf32>
    %25 = vector.shape_cast %22 : vector<224x224xf32> to vector<1x1x224x224xf32>
    tpu.vector_store %arg5[%c0_21, %c1_22, %c0_23, %c0_24], %25 {strides = array<i32>} : memref<1x3x224x224xf32, #tpu.memory_space<vmem>>, vector<1x1x224x224xf32>,
    %c0_25 = arith.constant 0 : index
    %c2 = arith.constant 2 : index
    %c0_26 = arith.constant 0 : index
    %c0_27 = arith.constant 0 : index
    %26 = vector.load %arg2[%c0_25, %c2, %c0_26, %c0_27] : memref<1x3x16x16xf32, #tpu.memory_space<vmem>>, vector<1x1x16x16xf32>
    %27 = vector.shape_cast %26 : vector<1x1x16x16xf32> to vector<16x16xf32>
    %28 = arith.truncf %27 : vector<16x16xf32> to vector<16x16xbf16>
    %cst_28 = arith.constant dense<0.000000e+00> : vector<16x224xf32>
    %29 = tpu.matmul %28, %0, %cst_28 {dimension_numbers = #tpu.dot_dimension_numbers<[1], [0], [0], [1], [0, 0, 1, 1], [], []>} : vector<16x16xbf16>, vector<16x224xbf16>, vector<16x224xf32> -> vector<16x224xf32>
    %cst_29 = arith.constant dense<0.000000e+00> : vector<224x224xf32>
    %30 = tpu.matmul %1, %29, %cst_29 {dimension_numbers = #tpu.dot_dimension_numbers<[1], [0], [0], [1], [0, 0, 1, 1], [], []>} : vector<224x16xf32>, vector<16x224xf32>, vector<224x224xf32> -> vector<224x224xf32>
    %cst_30 = arith.constant 3.62611675 : f32
    %31 = vector.broadcast %cst_30 : f32 to vector<224x224xf32>
    %32 = arith.mulf %30, %31 : vector<224x224xf32>
    %cst_31 = arith.constant -1.48021984 : f32
    %33 = vector.broadcast %cst_31 : f32 to vector<224x224xf32>
    %34 = arith.addf %32, %33 : vector<224x224xf32>
    %c0_32 = arith.constant 0 : index
    %c2_33 = arith.constant 2 : index
    %c0_34 = arith.constant 0 : index
    %c0_35 = arith.constant 0 : index
    %35 = vector.load %arg5[%c0_32, %c2_33, %c0_34, %c0_35] : memref<1x3x224x224xf32, #tpu.memory_space<vmem>>, vector<1x1x224x224xf32>
    %36 = vector.shape_cast %35 : vector<1x1x224x224xf32> to vector<224x224xf32>
    %37 = vector.shape_cast %34 : vector<224x224xf32> to vector<1x1x224x224xf32>
    tpu.vector_store %arg5[%c0_32, %c2_33, %c0_34, %c0_35], %37 {strides = array<i32>} : memref<1x3x224x224xf32, #tpu.memory_space<vmem>>, vector<1x1x224x224xf32>,
    return
  }
  func.func @transform_0(%arg0: i32, %arg1: i32) -> (i32, i32, i32, i32) {
    %c0_i32 = arith.constant 0 : i32
    %c0_i32_0 = arith.constant 0 : i32
    %c0_i32_1 = arith.constant 0 : i32
    return %arg0, %c0_i32, %arg1, %c0_i32_0 : i32, i32, i32, i32
  }
  func.func @transform_1(%arg0: i32, %arg1: i32) -> (i32, i32) {
    %c0_i32 = arith.constant 0 : i32
    %c0_i32_0 = arith.constant 0 : i32
    %c0_i32_1 = arith.constant 0 : i32
    return %c0_i32, %c0_i32_0 : i32, i32
  }
  func.func @transform_2(%arg0: i32, %arg1: i32) -> (i32, i32) {
    %c0_i32 = arith.constant 0 : i32
    %c0_i32_0 = arith.constant 0 : i32
    return %c0_i32, %arg1 : i32, i32
  }
  func.func @transform_3(%arg0: i32, %arg1: i32) -> (i32, i32, i32, i32) {
    %c0_i32 = arith.constant 0 : i32
    %c0_i32_0 = arith.constant 0 : i32
    %c0_i32_1 = arith.constant 0 : i32
    %c0_i32_2 = arith.constant 0 : i32
    return %arg0, %c0_i32, %c0_i32_0, %c0_i32_1 : i32, i32, i32, i32
  }
}

</mosaic_0001>

<bundles_post_ra>
// kernel: tpu_custom_call.1
= control target key start
LH: loop header
LB: loop body
LE: loop exit
PB: predicated region body
PF: predicated region fallthrough
CT: control target
= control target key end

     0   :  { %8 = vsyncpa [#allocation4], 0  ;;  %s3162_s0 = inlined_call_operand.hbm [shape: f32[2,3,16,16], index: 0, kind: input, shape index: {}]   ;;  %s3163_s1 = inlined_call_operand.hbm [shape: bf16[16,224], index: 1, kind: input, shape index: {}]   ;;  %s3164_s2 = inlined_call_operand.vmem [shape: f32[224,16], index: 2, kind: input, shape index: {}]   ;;  %s3165_s3 = inlined_call_operand.hbm [shape: f32[2,3,224,224], index: 3, kind: output, shape index: {}]  }
   0x1   :  { %10 = vsyncpa [#allocation4 + $0x1], 0 }
   0x2   :  { %11 = vsyncpa [#allocation7], 0 }
   0x3   :  { %12 = vsyncpa [#allocation5], 0 }
   0x4   :  { %14 = vsyncpa [#allocation5 + $0x1], 0  ;;  %s2319_s12 = smov 0   ;;  %s2321_s13 = smov 0  }
   0x5   :  { %s2323_s14 = smov 0   ;;  %s2325_s15 = smov 0  }
   0x6   :  { %s2327_s16 = smov 0   ;;  %s2329_s17 = smov 0  }
   0x7 LB: > { %s1842_s18 = sadd.s32 4294967295, %s2288_s17   ;;  %s1843_s19 = sadd.s32 4294967294, %s2288_s17   ;;  %s2288_s17 = sphi %s2329_s17, %s20_s17   ;;  %s2284_s16 = sphi %s2327_s16, %s3181_s16   ;;  %s2280_s15 = sphi %s2325_s15, %s3180_s15   ;;  %s2276_s14 = sphi %s2323_s14, %s3179_s14   ;;  %s2272_s13 = sphi %s2321_s13, %s3178_s13   ;;  %s2268_s12 = sphi %s2319_s12, %s3177_s12  }
   0x8   : > { %p54_p0 = scmp.ne.s32.totalorder %s2272_s13, %s2268_s12  ;;  %p2353_p1 = scmp.eq.s32.totalorder %s1842_s18, 0 }
   0x9   : > { %p2357_p2 = scmp.eq.s32.totalorder %s1842_s18, 1  ;;  %p131_p3 = scmp.eq.s32.totalorder %s1843_s19, 1 }
   0xa   : > { %p2363_p4 = por %p2353_p1, %p54_p0  ;;  %p1844_p5 = scmp.ge.s32.totalorder %s2288_s17, 1 }
   0xb   : > { %p2368_p6 = por %p131_p3, %p54_p0  ;;  %p138_p7 = scmp.lt.s32.totalorder %s2288_s17, 3 }
   0xc   : > { %s3169_s22 = scalar_select %p2363_p4, 1, 0 }
   0xd   : > { %s3170_s23 = scalar_select %p2368_p6, 1, 0 }
   0xe   : > { %p2373_p8 = pnand %p1844_p5, %p138_p7  ;;  %s2290_s25 = smov [#allocation6]  }
   0xf   : > { %s150_s26 = sshll.u32 %s2290_s25, 4  ;;  %p1847_p10 = scmp.ge.s32.totalorder %s2288_s17, 2  ;;  %s151_s26 = int_to_ptr.vmem [resolvable:$true] %s150_s26 }
  0x10   : > { %p2076_p9 = pneg %p2373_p8  ;;  %s32_s28 = sadd.s32 1, %s2284_s16 }
  0x11   : > { %s2161_s29 = scalar_lea.vmem %s151_s26, 256  ;;  %p2169_p5 = scmp.lt.s32.totalorder %s151_s26, %s151_s26 }
  0x12   : > { %p2382_p11 = pnand %p2076_p9, %p2353_p1  ;;  %p2162_p13 = scmp.ne.s32.totalorder %s151_s26, %s2161_s29 }
  0x13   : > { %p2170_p7 = scmp.lt.s32.totalorder %s2161_s29, %s2161_s29 }
  0x14   : > { %p2152_p12 = pneg %p2382_p11 }
  0x15   : > { %p2171_p6 = por %p2170_p7, %p2169_p5 }
  0x16   : > { %p2164_p0 = pnand %p2162_p13, %p2152_p12 }
  0x18   : > { %p2165_p3 = pneg %p2164_p0 }
  0x1a   : > { %p2172_p4 = pnand %p2171_p6, %p2165_p3 }
  0x1c   : > { %2175 = shalt.err (!%p2172_p4)
}
  0x1d   : > { %s2291_s30 = smov 128   ;;  %s2292_s4 = smov 8  }
  0x1e   : > { %2079 = dma.hbm_to_vmem [thread:$0]  (!%p2382_p11), %s3163_s1, 256, %s151_s26, [#allocation7], %s2291_s30, %s2291_s30, %s2292_s4  }
  0x1f   : > { %p34_p4 = scmp.ge.s32.totalorder %s32_s28, 2  ;;  %s41_s7 = sadd.s32 1, %s2276_s14 }
  0x20   : > { %p48_p6 = scmp.ne.s32.totalorder %s2276_s14, %s2272_s13  ;;  %p49_p9 = scmp.eq.s32.totalorder %s2288_s17, 0 }
  0x21   : > { %s3183_s28 = smov (%p34_p4, %s32_s28), 0  ;;  %p2089_p0 = scmp.lt.s32.totalorder %s2288_s17, 2 }
  0x22   : > { %p50_p12 = por %p49_p9, %p48_p6  ;;  %p2405_p13 = por %p2357_p2, %p48_p6 }
  0x23   : > { %s36_s9 = ssub.s32 %s2284_s16, %s3183_s28  ;;  %s171_s10 = sand.u32 1, %s2276_s14  }
  0x24   : > { %p39_p3 = scmp.eq.s32.totalorder %s36_s9, 0  ;;  %s2063_s11 = smul.u32 48, %s171_s10 }
  0x25   : > { %s2064_s19 = smul.u32 768, %s2284_s16  ;;  %p2417_p11 = pnand %p2089_p0, %p50_p12 }
  0x26   : > { %s2414_s18 = scalar_select %p39_p3, %s2276_s14, %s41_s7  }
  0x27   : > { %s175_s25 = scalar_lea.vmem [#allocation3], %s2063_s11  ;;  %s183_s5 = scalar_lea.hbm %s3162_s0, %s2064_s19 }
  0x28   : > { %s184_s26 = sshll.u32 %s175_s25, 4  ;;  %s172_s6 = scalar_lea.sflag [#allocation4], %s171_s10  ;;  %s185_s26 = int_to_ptr.vmem [resolvable:$true] %s184_s26 }
  0x29   : > { %p2178_p2 = pneg %p2417_p11  ;;  %s2189_s9 = scalar_lea.vmem %s185_s26, 768 }
  0x2a   : > { %p2190_p5 = scmp.ne.s32.totalorder %s185_s26, %s2189_s9  ;;  %s2293_s7 = smov [#allocation3]  }
  0x2b   : > { %s2194_s11 = sshll.u32 %s2293_s7, 4  ;;  %s2195_s11 = int_to_ptr.vmem [resolvable:$false] %s2194_s11 }
  0x2c   : > { %p2192_p7 = pnand %p2190_p5, %p2178_p2  ;;  %s2196_s25 = scalar_lea.vmem %s2195_s11, 1536 }
  0x2d   : > { %p2197_p6 = scmp.lt.s32.totalorder %s185_s26, %s2195_s11  ;;  %p2198_p9 = scmp.lt.s32.totalorder %s2196_s25, %s2189_s9 }
  0x2e   : > { %p2193_p4 = pneg %p2192_p7 }
  0x2f   : > { %p2199_p12 = por %p2198_p9, %p2197_p6 }
  0x31   : > { %p2200_p0 = pnand %p2199_p12, %p2193_p4 }
  0x33   : > { %2203 = shalt.err (!%p2200_p0)
}
  0x34   : > { %2083 = dma.hbm_to_vmem [thread:$0]  (!%p2417_p11), %s183_s5, 768, %s185_s26, %s172_s6, %s2291_s30, %s2291_s30, %s2292_s4  }
  0x35   : > { %196 = sbr.rel (%p2373_p8) target bundleno = 853 (0x355), region = 32  ;;  %s2434_s10 = sand.u32 (!%p2373_p8), 1, %s2272_s13  }
  0x36   : > { %s2065_s19 = smul.u32 (!%p2373_p8), 48, %s2434_s10  ;;  %s199_s29 = scalar_lea.sflag (!%p2373_p8), [#allocation4], %s2434_s10 }
  0x37   : > { %p3175_p3 = scmp.ne.s32.totalorder (!%p2373_p8), %s3169_s22, 0 }
  0x38   : > { %s2438_s21 = scalar_lea.vmem (!%p2373_p8), [#allocation3], %s2065_s19 }
  0x3a   : > { %2255 = dma.done.wait (%p3175_p3), %s199_s29, 768  }
  0x3b   : > { %2257 = vsyncadd (%p3175_p3), %s199_s29, 4294966528 }
  0x3c   : > { %2259 = dma.done.wait (%p2353_p1), [#allocation7], 256  }
  0x3d   : > { %2261 = vsyncadd (%p2353_p1), [#allocation7], 4294967040  ;;  %v2294_v0 = vmov 0   ;;  %v2147_v1 = vld [vmem:[#allocation6 + $0x4] ss:$8 sps:$4 sm:$0xff]   ;;  %vm282_vm0 = vcmask 130048  }
  0x3e   : > { %318 = vmatprep.mubr.bf16.mxu0 %v2294_v0  ;;  %v2149_v2 = vld [vmem:[#allocation6] ss:$8 sps:$4 sm:$0xff]   ;;  %300 = vmatprep.subr.bf16.mxu0 %v2147_v1  ;;  %v2295_v6 = vmov 0.0   ;;  %v2478_v14 = vld [vmem:[%s3164_s2 + $0x70] sm:$0xff]  ;;  %v2494_v16 = vld [vmem:[%s3164_s2 + $0x78] sm:$0xff]  ;;  %s2066_s11 = smul.u32 1344, %s2434_s10 }
  0x3f   : > { %v269_v3 = vld [vmem:[%s2438_s21] sm:$0xff]  ;;  %v270_v4 = vld [vmem:[%s2438_s21 + $0x8] sm:$0xff]  ;;  %301 = vmatpush1.bf16.msra.mxu0 %v2149_v2  ;;  %555 = vmatprep.mubr.f32.mxu1 %v2295_v6  ;;  %v1882_v37 = vld [vmem:[%s2438_s21 + $0x10] sm:$0xff]  ;;  %vm759_vm1 = vcmask 785408   ;;  %s2067_s25 = smul.u32 21504, %s2280_s15  ;;  %s1720_s15 = scalar_lea.sflag [#allocation5], %s2434_s10 }
  0x40   : > { %v271_v5 = vpack.c.bf16 %v270_v4, %v269_v3  ;;  %v2457_v11 = vld [vmem:[%s3164_s2] sm:$0xff]  ;;  %v2462_v12 = vld [vmem:[%s3164_s2 + $0x68] sm:$0xff]  ;;  %v2489_v15 = vld [vmem:[%s3164_s2 + $0x10] sm:$0xff]  ;;  %s2296_s30 = smov [#allocation8]  }
  0x41   : > { %v2473_v13 = vld [vmem:[%s3164_s2 + $0x8] sm:$0xff]  ;;  %v2505_v17 = vld [vmem:[%s3164_s2 + $0x18] sm:$0xff]  ;;  %v2510_v18 = vld [vmem:[%s3164_s2 + $0x80] sm:$0xff]  ;;  %s3109_s22 = scalar_lea.hbm %s3165_s3, %s2067_s25  ;;  %s2208_s4 = sshll.u32 %s2296_s30, 4  ;;  %s2209_s4 = int_to_ptr.vmem [resolvable:$false] %s2208_s4 }
  0x42   : > { %1853 = vmatmul.mubr.msk.bf16.vlgmr.msra.gmra.mxu0 %vm282_vm0, %v271_v5  ;;  %v2521_v19 = vld [vmem:[%s3164_s2 + $0x20] sm:$0xff]  ;;  %v2526_v20 = vld [vmem:[%s3164_s2 + $0x88] sm:$0xff]  ;;  %v2542_v22 = vld [vmem:[%s3164_s2 + $0x90] sm:$0xff]  ;;  %s2210_s26 = scalar_lea.vmem %s2209_s4, 43008 }
  0x43   : > { %477 = vmatprep.mubr.f32.mxu0 %v2295_v6  ;;  %v2537_v21 = vld [vmem:[%s3164_s2 + $0x28] sm:$0xff]  ;;  %v2553_v23 = vld [vmem:[%s3164_s2 + $0x30] sm:$0xff]  ;;  %v2558_v24 = vld [vmem:[%s3164_s2 + $0x98] sm:$0xff] }
  0x44   : > { %v2569_v25 = vld [vmem:[%s3164_s2 + $0x38] sm:$0xff]  ;;  %v2574_v26 = vld [vmem:[%s3164_s2 + $0xa0] sm:$0xff]  ;;  %v2590_v28 = vld [vmem:[%s3164_s2 + $0xa8] sm:$0xff] }
  0x45   : > { %v2585_v27 = vld [vmem:[%s3164_s2 + $0x40] sm:$0xff]  ;;  %v2601_v29 = vld [vmem:[%s3164_s2 + $0x48] sm:$0xff]  ;;  %v2606_v30 = vld [vmem:[%s3164_s2 + $0xb0] sm:$0xff] }
  0x46   : > { %v2617_v31 = vld [vmem:[%s3164_s2 + $0x50] sm:$0xff]  ;;  %v2622_v32 = vld [vmem:[%s3164_s2 + $0xb8] sm:$0xff]  ;;  %v2638_v34 = vld [vmem:[%s3164_s2 + $0xc0] sm:$0xff] }
  0x47   : > { %v2633_v33 = vld [vmem:[%s3164_s2 + $0x58] sm:$0xff]  ;;  %v2647_v35 = vld [vmem:[%s3164_s2 + $0x60] sm:$0xff]  ;;  %v2654_v36 = vld [vmem:[%s3164_s2 + $0xc8] sm:$0xff] }
  0x48   : > { %v1883_v38 = vld [vmem:[%s2438_s21 + $0x18] sm:$0xff]  ;;  %v2667_v40 = vld [vmem:[%s3164_s2 + $0xd0] sm:$0xff]  ;;  %v1970_v43 = vld [vmem:[%s2438_s21 + $0x28] sm:$0xff] }
  0x49   : > { %v818_v39 = vpack.c.bf16 %v1883_v38, %v1882_v37  ;;  %v2676_v41 = vld [vmem:[%s3164_s2 + $0xd8] sm:$0xff]  ;;  %v1969_v42 = vld [vmem:[%s2438_s21 + $0x20] sm:$0xff]  ;;  %s2687_s21 = scalar_lea.vmem [#allocation8], %s2066_s11 }
  0x4a   : > { %v1270_v44 = vpack.c.bf16 %v1970_v43, %v1969_v42  ;;  %s1733_s19 = sshll.u32 %s2687_s21, 4  ;;  %s3111_s19 = int_to_ptr.vmem [resolvable:$true] %s1733_s19 }
  0x4b   : > { %s2204_s24 = scalar_lea.vmem %s3111_s19, 21504  ;;  %p2211_p2 = scmp.lt.s32.totalorder %s3111_s19, %s2209_s4 }
  0x4c   : > { %p2205_p1 = scmp.ne.s32.totalorder %s3111_s19, %s2204_s24  ;;  %p2212_p5 = scmp.lt.s32.totalorder %s2210_s26, %s2204_s24 }
  0x4e   : > { %p2206_p8 = pnand %p2205_p1, %p2405_p13  ;;  %p2213_p7 = por %p2212_p5, %p2211_p2 }
  0x50   : > { %p2207_p11 = pneg %p2206_p8 }
  0x52   : > { %p2214_p4 = pnand %p2213_p7, %p2207_p11 }
 0x102   : > { %v320_v7 = vpop.f32.mrf.mxu0 }
 0x104   : > { %v322_v8 = vpop.f32.mrf.mxu0 }
 0x106   : > { %v324_v9 = vpop.f32.mrf.mxu0 }
 0x108   : > { %v326_v10 = vpop.f32.mrf.mxu0 }
 0x109   : > { %441 = vmatprep.subr.mxu0 %v326_v10  ;;  %2059 = vmatprep.subr.mxu1 %v326_v10 }
 0x10a   : > { %442 = vmatpush1.msra.mxu0 %v324_v9  ;;  %2061 = vmatpush1.msra.mxu1 %v324_v9 }
 0x10b   : > { %443 = vmatprep.subr.mxu0 %v322_v8  ;;  %2060 = vmatprep.subr.mxu1 %v322_v8 }
 0x10c   : > { %444 = vmatpush1.msra.mxu0 %v320_v7  ;;  %2062 = vmatpush1.msra.mxu1 %v320_v7 }
 0x10d   : > { %1854 = vmatmul.mubr.msk.f32.vlgmr.msra.gmra.mxu0 %vm282_vm0, %v2457_v11  ;;  %1867 = vmatmul.mubr.msk.f32.vlgmr.msra.gmra.mxu1 %vm282_vm0, %v2462_v12 }
 0x10e   : > { %483 = vmatprep.mubr.f32.mxu0 %v2295_v6  ;;  %561 = vmatprep.mubr.f32.mxu1 %v2295_v6 }
 0x10f   : > { %1288 = vmatprep.subr.bf16.mxu1 %v2147_v1  ;;  %836 = vmatprep.subr.bf16.mxu0 %v2147_v1 }
 0x110   : > { %1289 = vmatpush1.bf16.msra.mxu1 %v2149_v2  ;;  %837 = vmatpush1.bf16.msra.mxu0 %v2149_v2 }
 0x111   : > { %1855 = vmatmul.mubr.msk.f32.gmra.mxu0 %vm282_vm0, %v2473_v13  ;;  %1868 = vmatmul.mubr.msk.f32.gmra.mxu1 %vm282_vm0, %v2478_v14 }
 0x112   : > { %489 = vmatprep.mubr.f32.mxu0 %v2295_v6  ;;  %567 = vmatprep.mubr.f32.mxu1 %v2295_v6 }
 0x115   : > { %1856 = vmatmul.mubr.msk.f32.gmra.mxu0 %vm282_vm0, %v2489_v15  ;;  %1869 = vmatmul.mubr.msk.f32.gmra.mxu1 %vm282_vm0, %v2494_v16 }
 0x116   : > { %495 = vmatprep.mubr.f32.mxu0 %v2295_v6  ;;  %573 = vmatprep.mubr.f32.mxu1 %v2295_v6 }
 0x119   : > { %1857 = vmatmul.mubr.msk.f32.gmra.mxu0 %vm282_vm0, %v2505_v17  ;;  %1870 = vmatmul.mubr.msk.f32.gmra.mxu1 %vm282_vm0, %v2510_v18 }
 0x11a   : > { %501 = vmatprep.mubr.f32.mxu0 %v2295_v6  ;;  %579 = vmatprep.mubr.f32.mxu1 %v2295_v6 }
 0x11d   : > { %1858 = vmatmul.mubr.msk.f32.gmra.mxu0 %vm282_vm0, %v2521_v19  ;;  %1871 = vmatmul.mubr.msk.f32.gmra.mxu1 %vm282_vm0, %v2526_v20 }
 0x11e   : > { %507 = vmatprep.mubr.f32.mxu0 %v2295_v6  ;;  %585 = vmatprep.mubr.f32.mxu1 %v2295_v6 }
 0x121   : > { %1859 = vmatmul.mubr.msk.f32.gmra.mxu0 %vm282_vm0, %v2537_v21  ;;  %1872 = vmatmul.mubr.msk.f32.gmra.mxu1 %vm282_vm0, %v2542_v22 }
 0x122   : > { %513 = vmatprep.mubr.f32.mxu0 %v2295_v6  ;;  %591 = vmatprep.mubr.f32.mxu1 %v2295_v6 }
 0x125   : > { %1860 = vmatmul.mubr.msk.f32.gmra.mxu0 %vm282_vm0, %v2553_v23  ;;  %1873 = vmatmul.mubr.msk.f32.gmra.mxu1 %vm282_vm0, %v2558_v24 }
 0x126   : > { %519 = vmatprep.mubr.f32.mxu0 %v2295_v6  ;;  %597 = vmatprep.mubr.f32.mxu1 %v2295_v6 }
 0x129   : > { %1861 = vmatmul.mubr.msk.f32.gmra.mxu0 %vm282_vm0, %v2569_v25  ;;  %1874 = vmatmul.mubr.msk.f32.gmra.mxu1 %vm282_vm0, %v2574_v26 }
 0x12a   : > { %525 = vmatprep.mubr.f32.mxu0 %v2295_v6  ;;  %603 = vmatprep.mubr.f32.mxu1 %v2295_v6 }
 0x12d   : > { %1862 = vmatmul.mubr.msk.f32.gmra.mxu0 %vm282_vm0, %v2585_v27  ;;  %1875 = vmatmul.mubr.msk.f32.gmra.mxu1 %vm282_vm0, %v2590_v28 }
 0x12e   : > { %531 = vmatprep.mubr.f32.mxu0 %v2295_v6  ;;  %609 = vmatprep.mubr.f32.mxu1 %v2295_v6 }
 0x131   : > { %1863 = vmatmul.mubr.msk.f32.gmra.mxu0 %vm282_vm0, %v2601_v29  ;;  %1876 = vmatmul.mubr.msk.f32.gmra.mxu1 %vm282_vm0, %v2606_v30 }
 0x132   : > { %537 = vmatprep.mubr.f32.mxu0 %v2295_v6  ;;  %615 = vmatprep.mubr.f32.mxu1 %v2295_v6 }
 0x135   : > { %1864 = vmatmul.mubr.msk.f32.gmra.mxu0 %vm282_vm0, %v2617_v31  ;;  %1877 = vmatmul.mubr.msk.f32.gmra.mxu1 %vm282_vm0, %v2622_v32 }
 0x136   : > { %543 = vmatprep.mubr.f32.mxu0 %v2295_v6  ;;  %621 = vmatprep.mubr.f32.mxu1 %v2295_v6 }
 0x139   : > { %1865 = vmatmul.mubr.msk.f32.gmra.mxu0 %vm282_vm0, %v2633_v33  ;;  %1878 = vmatmul.mubr.msk.f32.gmra.mxu1 %vm282_vm0, %v2638_v34 }
 0x13a   : > { %549 = vmatprep.mubr.f32.mxu0 %v2295_v6  ;;  %627 = vmatprep.mubr.f32.mxu1 %v2295_v6 }
 0x13d   : > { %1866 = vmatmul.mubr.msk.f32.gmra.mxu0 %vm282_vm0, %v2647_v35  ;;  %1879 = vmatmul.mubr.msk.f32.gmra.mxu1 %vm282_vm0, %v2654_v36 }
 0x13e   : > { %633 = vmatprep.mubr.f32.mxu1 %v2295_v6  ;;  %854 = vmatprep.mubr.bf16.mxu0 %v2294_v0 }
 0x141   : > { %1880 = vmatmul.mubr.msk.f32.gmra.mxu1 %vm282_vm0, %v2667_v40  ;;  %1884 = vmatmul.mubr.msk.bf16.vlgmr.msra.gmra.mxu0 %vm282_vm0, %v818_v39 }
 0x142   : > { %639 = vmatprep.mubr.f32.mxu1 %v2295_v6  ;;  %929 = vmatprep.mubr.f32.mxu0 %v2295_v6 }
 0x145   : > { %1881 = vmatmul.mubr.msk.f32.gmra.mxu1 %vm282_vm0, %v2676_v41 }
 0x146   : > { %1306 = vmatprep.mubr.bf16.mxu1 %v2294_v0 }
 0x149   : > { %1971 = vmatmul.mubr.msk.bf16.vlgmr.msra.gmra.mxu1 %vm282_vm0, %v1270_v44 }
 0x14a   : > { %1381 = vmatprep.mubr.f32.mxu1 %v2295_v6 }
 0x1cd   : > { %v479_v45 = vpop.f32.mrf.mxu0  ;;  %v557_v46 = vpop.f32.mrf.mxu1 }
 0x1ce   : > { %v646_v47 = vmul.f32 3.7225986, %v479_v45  ;;  %v672_v48 = vmul.f32 3.7225986, %v557_v46 }
 0x1cf   : > { %v481_v49 = vpop.f32.mrf.mxu0  ;;  %v559_v50 = vpop.f32.mrf.mxu1 }
 0x1d0   : > { %v702_v51 = vadd.f32 -1.7922626, %v646_v47  ;;  %v728_v52 = vadd.f32 -1.7922626, %v672_v48  ;;  %v647_v53 = vmul.f32 3.7225986, %v481_v49 }
 0x1d1   : > { %v673_v54 = vmul.f32 3.7225986, %v559_v50  ;;  %v485_v55 = vpop.f32.mrf.mxu0  ;;  %v563_v56 = vpop.f32.mrf.mxu1 }
 0x1d2   : > { %758 = vst [vmem:[%s2687_s21] sm:$0xff] %v702_v51  ;;  %785 = vst [vmem:[%s2687_s21 + $0xd0] sm:$0xff] %v728_v52  ;;  %v703_v57 = vadd.f32 -1.7922626, %v647_v53  ;;  %v648_v58 = vmul.f32 3.7225986, %v485_v55 }
 0x1d3   : > { %v674_v59 = vmul.f32 3.7225986, %v563_v56  ;;  %v729_v60 = vadd.f32 -1.7922626, %v673_v54  ;;  %v487_v61 = vpop.f32.mrf.mxu0  ;;  %v565_v62 = vpop.f32.mrf.mxu1 }
 0x1d4   : > { %760 = vst.msk [vmem:[%s2687_s21 + $0x8] sm:$0xff] %vm759_vm1, %v703_v57  ;;  %v704_v63 = vadd.f32 -1.7922626, %v648_v58  ;;  %v649_v1 = vmul.f32 3.7225986, %v487_v61 }
 0x1d5   : > { %v730_v0 = vadd.f32 -1.7922626, %v674_v59  ;;  %786 = vst.msk [vmem:[%s2687_s21 + $0xd8] sm:$0xff] %vm759_vm1, %v729_v60  ;;  %v675_v2 = vmul.f32 3.7225986, %v565_v62  ;;  %v491_v3 = vpop.f32.mrf.mxu0  ;;  %v569_v4 = vpop.f32.mrf.mxu1 }
 0x1d6   : > { %761 = vst [vmem:[%s2687_s21 + $0x10] sm:$0xff] %v704_v63  ;;  %v705_v5 = vadd.f32 -1.7922626, %v649_v1  ;;  %v650_v7 = vmul.f32 3.7225986, %v491_v3 }
 0x1d7   : > { %787 = vst [vmem:[%s2687_s21 + $0xe0] sm:$0xff] %v730_v0  ;;  %v676_v8 = vmul.f32 3.7225986, %v569_v4  ;;  %v731_v9 = vadd.f32 -1.7922626, %v675_v2  ;;  %v493_v10 = vpop.f32.mrf.mxu0  ;;  %v571_v37 = vpop.f32.mrf.mxu1 }
 0x1d8   : > { %762 = vst.msk [vmem:[%s2687_s21 + $0x18] sm:$0xff] %vm759_vm1, %v705_v5  ;;  %v706_v38 = vadd.f32 -1.7922626, %v650_v7  ;;  %v651_v42 = vmul.f32 3.7225986, %v493_v10 }
 0x1d9   : > { %v732_v39 = vadd.f32 -1.7922626, %v676_v8  ;;  %788 = vst.msk [vmem:[%s2687_s21 + $0xe8] sm:$0xff] %vm759_vm1, %v731_v9  ;;  %v677_v43 = vmul.f32 3.7225986, %v571_v37  ;;  %v497_v44 = vpop.f32.mrf.mxu0  ;;  %v575_v45 = vpop.f32.mrf.mxu1 }
 0x1da   : > { %763 = vst [vmem:[%s2687_s21 + $0x20] sm:$0xff] %v706_v38  ;;  %v707_v46 = vadd.f32 -1.7922626, %v651_v42  ;;  %v652_v47 = vmul.f32 3.7225986, %v497_v44 }
 0x1db   : > { %789 = vst [vmem:[%s2687_s21 + $0xf0] sm:$0xff] %v732_v39  ;;  %v678_v48 = vmul.f32 3.7225986, %v575_v45  ;;  %v733_v49 = vadd.f32 -1.7922626, %v677_v43  ;;  %v499_v50 = vpop.f32.mrf.mxu0  ;;  %v577_v51 = vpop.f32.mrf.mxu1 }
 0x1dc   : > { %764 = vst.msk [vmem:[%s2687_s21 + $0x28] sm:$0xff] %vm759_vm1, %v707_v46  ;;  %v708_v52 = vadd.f32 -1.7922626, %v652_v47  ;;  %v653_v54 = vmul.f32 3.7225986, %v499_v50 }
 0x1dd   : > { %v734_v53 = vadd.f32 -1.7922626, %v678_v48  ;;  %790 = vst.msk [vmem:[%s2687_s21 + $0xf8] sm:$0xff] %vm759_vm1, %v733_v49  ;;  %v679_v55 = vmul.f32 3.7225986, %v577_v51  ;;  %v503_v56 = vpop.f32.mrf.mxu0  ;;  %v581_v57 = vpop.f32.mrf.mxu1 }
 0x1de   : > { %765 = vst [vmem:[%s2687_s21 + $0x30] sm:$0xff] %v708_v52  ;;  %v709_v58 = vadd.f32 -1.7922626, %v653_v54  ;;  %v654_v59 = vmul.f32 3.7225986, %v503_v56 }
 0x1df   : > { %791 = vst [vmem:[%s2687_s21 + $0x100] sm:$0xff] %v734_v53  ;;  %v680_v60 = vmul.f32 3.7225986, %v581_v57  ;;  %v735_v61 = vadd.f32 -1.7922626, %v679_v55  ;;  %v505_v62 = vpop.f32.mrf.mxu0  ;;  %v583_v63 = vpop.f32.mrf.mxu1 }
 0x1e0   : > { %766 = vst.msk [vmem:[%s2687_s21 + $0x38] sm:$0xff] %vm759_vm1, %v709_v58  ;;  %v710_v0 = vadd.f32 -1.7922626, %v654_v59  ;;  %v655_v2 = vmul.f32 3.7225986, %v505_v62 }
 0x1e1   : > { %v736_v1 = vadd.f32 -1.7922626, %v680_v60  ;;  %792 = vst.msk [vmem:[%s2687_s21 + $0x108] sm:$0xff] %vm759_vm1, %v735_v61  ;;  %v681_v3 = vmul.f32 3.7225986, %v583_v63  ;;  %v509_v4 = vpop.f32.mrf.mxu0  ;;  %v587_v5 = vpop.f32.mrf.mxu1 }
 0x1e2   : > { %767 = vst [vmem:[%s2687_s21 + $0x40] sm:$0xff] %v710_v0  ;;  %v711_v7 = vadd.f32 -1.7922626, %v655_v2  ;;  %v656_v8 = vmul.f32 3.7225986, %v509_v4 }
 0x1e3   : > { %793 = vst [vmem:[%s2687_s21 + $0x110] sm:$0xff] %v736_v1  ;;  %v682_v9 = vmul.f32 3.7225986, %v587_v5  ;;  %v737_v10 = vadd.f32 -1.7922626, %v681_v3  ;;  %v511_v37 = vpop.f32.mrf.mxu0  ;;  %v589_v38 = vpop.f32.mrf.mxu1 }
 0x1e4   : > { %768 = vst.msk [vmem:[%s2687_s21 + $0x48] sm:$0xff] %vm759_vm1, %v711_v7  ;;  %v712_v39 = vadd.f32 -1.7922626, %v656_v8  ;;  %v657_v43 = vmul.f32 3.7225986, %v511_v37 }
 0x1e5   : > { %v738_v42 = vadd.f32 -1.7922626, %v682_v9  ;;  %794 = vst.msk [vmem:[%s2687_s21 + $0x118] sm:$0xff] %vm759_vm1, %v737_v10  ;;  %v683_v44 = vmul.f32 3.7225986, %v589_v38  ;;  %v515_v45 = vpop.f32.mrf.mxu0  ;;  %v593_v46 = vpop.f32.mrf.mxu1 }
 0x1e6   : > { %769 = vst [vmem:[%s2687_s21 + $0x50] sm:$0xff] %v712_v39  ;;  %v713_v47 = vadd.f32 -1.7922626, %v657_v43  ;;  %v658_v48 = vmul.f32 3.7225986, %v515_v45 }
 0x1e7   : > { %795 = vst [vmem:[%s2687_s21 + $0x120] sm:$0xff] %v738_v42  ;;  %v684_v49 = vmul.f32 3.7225986, %v593_v46  ;;  %v739_v50 = vadd.f32 -1.7922626, %v683_v44  ;;  %v517_v51 = vpop.f32.mrf.mxu0  ;;  %v595_v52 = vpop.f32.mrf.mxu1 }
 0x1e8   : > { %770 = vst.msk [vmem:[%s2687_s21 + $0x58] sm:$0xff] %vm759_vm1, %v713_v47  ;;  %v714_v53 = vadd.f32 -1.7922626, %v658_v48  ;;  %v659_v55 = vmul.f32 3.7225986, %v517_v51 }
 0x1e9   : > { %v740_v54 = vadd.f32 -1.7922626, %v684_v49  ;;  %796 = vst.msk [vmem:[%s2687_s21 + $0x128] sm:$0xff] %vm759_vm1, %v739_v50  ;;  %v685_v56 = vmul.f32 3.7225986, %v595_v52  ;;  %v521_v57 = vpop.f32.mrf.mxu0  ;;  %v599_v58 = vpop.f32.mrf.mxu1 }
 0x1ea   : > { %771 = vst [vmem:[%s2687_s21 + $0x60] sm:$0xff] %v714_v53  ;;  %v715_v59 = vadd.f32 -1.7922626, %v659_v55  ;;  %v660_v60 = vmul.f32 3.7225986, %v521_v57 }
 0x1eb   : > { %797 = vst [vmem:[%s2687_s21 + $0x130] sm:$0xff] %v740_v54  ;;  %v686_v61 = vmul.f32 3.7225986, %v599_v58  ;;  %v741_v62 = vadd.f32 -1.7922626, %v685_v56  ;;  %v523_v63 = vpop.f32.mrf.mxu0  ;;  %v601_v0 = vpop.f32.mrf.mxu1 }
 0x1ec   : > { %772 = vst.msk [vmem:[%s2687_s21 + $0x68] sm:$0xff] %vm759_vm1, %v715_v59  ;;  %v716_v1 = vadd.f32 -1.7922626, %v660_v60  ;;  %v661_v3 = vmul.f32 3.7225986, %v523_v63 }
 0x1ed   : > { %v742_v2 = vadd.f32 -1.7922626, %v686_v61  ;;  %798 = vst.msk [vmem:[%s2687_s21 + $0x138] sm:$0xff] %vm759_vm1, %v741_v62  ;;  %v687_v4 = vmul.f32 3.7225986, %v601_v0  ;;  %v527_v5 = vpop.f32.mrf.mxu0  ;;  %v605_v7 = vpop.f32.mrf.mxu1 }
 0x1ee   : > { %773 = vst [vmem:[%s2687_s21 + $0x70] sm:$0xff] %v716_v1  ;;  %v717_v8 = vadd.f32 -1.7922626, %v661_v3  ;;  %v662_v9 = vmul.f32 3.7225986, %v527_v5 }
 0x1ef   : > { %799 = vst [vmem:[%s2687_s21 + $0x140] sm:$0xff] %v742_v2  ;;  %v688_v10 = vmul.f32 3.7225986, %v605_v7  ;;  %v743_v37 = vadd.f32 -1.7922626, %v687_v4  ;;  %v529_v38 = vpop.f32.mrf.mxu0  ;;  %v607_v39 = vpop.f32.mrf.mxu1 }
 0x1f0   : > { %774 = vst.msk [vmem:[%s2687_s21 + $0x78] sm:$0xff] %vm759_vm1, %v717_v8  ;;  %v718_v42 = vadd.f32 -1.7922626, %v662_v9  ;;  %v663_v44 = vmul.f32 3.7225986, %v529_v38 }
 0x1f1   : > { %v744_v43 = vadd.f32 -1.7922626, %v688_v10  ;;  %800 = vst.msk [vmem:[%s2687_s21 + $0x148] sm:$0xff] %vm759_vm1, %v743_v37  ;;  %v689_v45 = vmul.f32 3.7225986, %v607_v39  ;;  %v533_v46 = vpop.f32.mrf.mxu0  ;;  %v611_v47 = vpop.f32.mrf.mxu1 }
 0x1f2   : > { %775 = vst [vmem:[%s2687_s21 + $0x80] sm:$0xff] %v718_v42  ;;  %v719_v48 = vadd.f32 -1.7922626, %v663_v44  ;;  %v664_v49 = vmul.f32 3.7225986, %v533_v46 }
 0x1f3   : > { %801 = vst [vmem:[%s2687_s21 + $0x150] sm:$0xff] %v744_v43  ;;  %v690_v50 = vmul.f32 3.7225986, %v611_v47  ;;  %v745_v51 = vadd.f32 -1.7922626, %v689_v45  ;;  %v535_v52 = vpop.f32.mrf.mxu0  ;;  %v613_v53 = vpop.f32.mrf.mxu1 }
 0x1f4   : > { %776 = vst.msk [vmem:[%s2687_s21 + $0x88] sm:$0xff] %vm759_vm1, %v719_v48  ;;  %v720_v54 = vadd.f32 -1.7922626, %v664_v49  ;;  %v665_v56 = vmul.f32 3.7225986, %v535_v52 }
 0x1f5   : > { %v746_v55 = vadd.f32 -1.7922626, %v690_v50  ;;  %802 = vst.msk [vmem:[%s2687_s21 + $0x158] sm:$0xff] %vm759_vm1, %v745_v51  ;;  %v691_v57 = vmul.f32 3.7225986, %v613_v53  ;;  %v539_v58 = vpop.f32.mrf.mxu0  ;;  %v617_v59 = vpop.f32.mrf.mxu1 }
 0x1f6   : > { %777 = vst [vmem:[%s2687_s21 + $0x90] sm:$0xff] %v720_v54  ;;  %v721_v60 = vadd.f32 -1.7922626, %v665_v56  ;;  %v666_v61 = vmul.f32 3.7225986, %v539_v58 }
 0x1f7   : > { %803 = vst [vmem:[%s2687_s21 + $0x160] sm:$0xff] %v746_v55  ;;  %v692_v62 = vmul.f32 3.7225986, %v617_v59  ;;  %v747_v63 = vadd.f32 -1.7922626, %v691_v57  ;;  %v541_v0 = vpop.f32.mrf.mxu0  ;;  %v619_v1 = vpop.f32.mrf.mxu1 }
 0x1f8   : > { %778 = vst.msk [vmem:[%s2687_s21 + $0x98] sm:$0xff] %vm759_vm1, %v721_v60  ;;  %v722_v2 = vadd.f32 -1.7922626, %v666_v61  ;;  %v667_v4 = vmul.f32 3.7225986, %v541_v0 }
 0x1f9   : > { %v748_v3 = vadd.f32 -1.7922626, %v692_v62  ;;  %804 = vst.msk [vmem:[%s2687_s21 + $0x168] sm:$0xff] %vm759_vm1, %v747_v63  ;;  %v693_v5 = vmul.f32 3.7225986, %v619_v1  ;;  %v545_v7 = vpop.f32.mrf.mxu0  ;;  %v623_v8 = vpop.f32.mrf.mxu1 }
 0x1fa   : > { %779 = vst [vmem:[%s2687_s21 + $0xa0] sm:$0xff] %v722_v2  ;;  %v723_v9 = vadd.f32 -1.7922626, %v667_v4  ;;  %v668_v10 = vmul.f32 3.7225986, %v545_v7 }
 0x1fb   : > { %805 = vst [vmem:[%s2687_s21 + $0x170] sm:$0xff] %v748_v3  ;;  %v694_v37 = vmul.f32 3.7225986, %v623_v8  ;;  %v749_v38 = vadd.f32 -1.7922626, %v693_v5  ;;  %v547_v39 = vpop.f32.mrf.mxu0  ;;  %v625_v42 = vpop.f32.mrf.mxu1 }
 0x1fc   : > { %780 = vst.msk [vmem:[%s2687_s21 + $0xa8] sm:$0xff] %vm759_vm1, %v723_v9  ;;  %v724_v43 = vadd.f32 -1.7922626, %v668_v10  ;;  %v669_v45 = vmul.f32 3.7225986, %v547_v39 }
 0x1fd   : > { %v750_v44 = vadd.f32 -1.7922626, %v694_v37  ;;  %806 = vst.msk [vmem:[%s2687_s21 + $0x178] sm:$0xff] %vm759_vm1, %v749_v38  ;;  %v695_v46 = vmul.f32 3.7225986, %v625_v42  ;;  %v551_v47 = vpop.f32.mrf.mxu0  ;;  %v629_v48 = vpop.f32.mrf.mxu1 }
 0x1fe   : > { %781 = vst [vmem:[%s2687_s21 + $0xb0] sm:$0xff] %v724_v43  ;;  %v725_v49 = vadd.f32 -1.7922626, %v669_v45  ;;  %v670_v50 = vmul.f32 3.7225986, %v551_v47 }
 0x1ff   : > { %807 = vst [vmem:[%s2687_s21 + $0x180] sm:$0xff] %v750_v44  ;;  %v696_v51 = vmul.f32 3.7225986, %v629_v48  ;;  %v751_v52 = vadd.f32 -1.7922626, %v695_v46  ;;  %v553_v53 = vpop.f32.mrf.mxu0  ;;  %v631_v54 = vpop.f32.mrf.mxu1 }
 0x200   : > { %782 = vst.msk [vmem:[%s2687_s21 + $0xb8] sm:$0xff] %vm759_vm1, %v725_v49  ;;  %v726_v55 = vadd.f32 -1.7922626, %v670_v50  ;;  %v671_v57 = vmul.f32 3.7225986, %v553_v53 }
 0x201   : > { %v752_v56 = vadd.f32 -1.7922626, %v696_v51  ;;  %808 = vst.msk [vmem:[%s2687_s21 + $0x188] sm:$0xff] %vm759_vm1, %v751_v52  ;;  %v697_v58 = vmul.f32 3.7225986, %v631_v54  ;;  %v635_v59 = vpop.f32.mrf.mxu1  ;;  %v856_v60 = vpop.f32.mrf.mxu0 }
 0x202   : > { %783 = vst [vmem:[%s2687_s21 + $0xc0] sm:$0xff] %v726_v55  ;;  %v727_v61 = vadd.f32 -1.7922626, %v671_v57  ;;  %v698_v62 = vmul.f32 3.7225986, %v635_v59 }
 0x203   : > { %809 = vst [vmem:[%s2687_s21 + $0x190] sm:$0xff] %v752_v56  ;;  %v753_v63 = vadd.f32 -1.7922626, %v697_v58  ;;  %v637_v0 = vpop.f32.mrf.mxu1  ;;  %v858_v1 = vpop.f32.mrf.mxu0 }
 0x204   : > { %784 = vst.msk [vmem:[%s2687_s21 + $0xc8] sm:$0xff] %vm759_vm1, %v727_v61  ;;  %v754_v2 = vadd.f32 -1.7922626, %v698_v62  ;;  %v699_v3 = vmul.f32 3.7225986, %v637_v0 }
 0x205   : > { %810 = vst.msk [vmem:[%s2687_s21 + $0x198] sm:$0xff] %vm759_vm1, %v753_v63  ;;  %v641_v4 = vpop.f32.mrf.mxu1  ;;  %v860_v5 = vpop.f32.mrf.mxu0 }
 0x206   : > { %811 = vst [vmem:[%s2687_s21 + $0x1a0] sm:$0xff] %v754_v2  ;;  %v755_v7 = vadd.f32 -1.7922626, %v699_v3  ;;  %v700_v8 = vmul.f32 3.7225986, %v641_v4 }
 0x207   : > { %v643_v9 = vpop.f32.mrf.mxu1  ;;  %v862_v10 = vpop.f32.mrf.mxu0 }
 0x208   : > { %812 = vst.msk [vmem:[%s2687_s21 + $0x1a8] sm:$0xff] %vm759_vm1, %v755_v7  ;;  %v756_v37 = vadd.f32 -1.7922626, %v700_v8  ;;  %v701_v38 = vmul.f32 3.7225986, %v643_v9  ;;  %893 = vmatprep.subr.mxu0 %v862_v10 }
 0x209   : > { %894 = vmatpush1.msra.mxu0 %v860_v5  ;;  %v1308_v39 = vpop.f32.mrf.mxu1 }
 0x20a   : > { %813 = vst [vmem:[%s2687_s21 + $0x1b0] sm:$0xff] %v756_v37  ;;  %v757_v42 = vadd.f32 -1.7922626, %v701_v38  ;;  %895 = vmatprep.subr.mxu0 %v858_v1 }
 0x20b   : > { %896 = vmatpush1.msra.mxu0 %v856_v60  ;;  %v1310_v43 = vpop.f32.mrf.mxu1 }
 0x20c   : > { %814 = vst.msk [vmem:[%s2687_s21 + $0x1b8] sm:$0xff] %vm759_vm1, %v757_v42  ;;  %1885 = vmatmul.mubr.msk.f32.vlgmr.msra.gmra.mxu0 %vm282_vm0, %v2457_v11 }
 0x20d   : > { %v1312_v44 = vpop.f32.mrf.mxu1  ;;  %935 = vmatprep.mubr.f32.mxu0 %v2295_v6 }
 0x20f   : > { %v1314_v45 = vpop.f32.mrf.mxu1 }
 0x210   : > { %1345 = vmatprep.subr.mxu1 %v1314_v45  ;;  %1886 = vmatmul.mubr.msk.f32.gmra.mxu0 %vm282_vm0, %v2473_v13 }
 0x211   : > { %1346 = vmatpush1.msra.mxu1 %v1312_v44  ;;  %941 = vmatprep.mubr.f32.mxu0 %v2295_v6 }
 0x212   : > { %1347 = vmatprep.subr.mxu1 %v1310_v43 }
 0x213   : > { %1348 = vmatpush1.msra.mxu1 %v1308_v39 }
 0x214   : > { %1972 = vmatmul.mubr.msk.f32.vlgmr.msra.gmra.mxu1 %vm282_vm0, %v2457_v11  ;;  %1887 = vmatmul.mubr.msk.f32.gmra.mxu0 %vm282_vm0, %v2489_v15 }
 0x215   : > { %1387 = vmatprep.mubr.f32.mxu1 %v2295_v6  ;;  %947 = vmatprep.mubr.f32.mxu0 %v2295_v6 }
 0x218   : > { %1973 = vmatmul.mubr.msk.f32.gmra.mxu1 %vm282_vm0, %v2473_v13  ;;  %1888 = vmatmul.mubr.msk.f32.gmra.mxu0 %vm282_vm0, %v2505_v17 }
 0x219   : > { %1393 = vmatprep.mubr.f32.mxu1 %v2295_v6  ;;  %953 = vmatprep.mubr.f32.mxu0 %v2295_v6 }
 0x21c   : > { %1974 = vmatmul.mubr.msk.f32.gmra.mxu1 %vm282_vm0, %v2489_v15  ;;  %1889 = vmatmul.mubr.msk.f32.gmra.mxu0 %vm282_vm0, %v2521_v19 }
 0x21d   : > { %1399 = vmatprep.mubr.f32.mxu1 %v2295_v6  ;;  %959 = vmatprep.mubr.f32.mxu0 %v2295_v6 }
 0x220   : > { %1975 = vmatmul.mubr.msk.f32.gmra.mxu1 %vm282_vm0, %v2505_v17  ;;  %1890 = vmatmul.mubr.msk.f32.gmra.mxu0 %vm282_vm0, %v2537_v21 }
 0x221   : > { %1405 = vmatprep.mubr.f32.mxu1 %v2295_v6  ;;  %965 = vmatprep.mubr.f32.mxu0 %v2295_v6 }
 0x224   : > { %1976 = vmatmul.mubr.msk.f32.gmra.mxu1 %vm282_vm0, %v2521_v19  ;;  %1891 = vmatmul.mubr.msk.f32.gmra.mxu0 %vm282_vm0, %v2553_v23 }
 0x225   : > { %1411 = vmatprep.mubr.f32.mxu1 %v2295_v6  ;;  %971 = vmatprep.mubr.f32.mxu0 %v2295_v6 }
 0x228   : > { %1977 = vmatmul.mubr.msk.f32.gmra.mxu1 %vm282_vm0, %v2537_v21  ;;  %1892 = vmatmul.mubr.msk.f32.gmra.mxu0 %vm282_vm0, %v2569_v25 }
 0x229   : > { %1417 = vmatprep.mubr.f32.mxu1 %v2295_v6  ;;  %977 = vmatprep.mubr.f32.mxu0 %v2295_v6 }
 0x22c   : > { %1978 = vmatmul.mubr.msk.f32.gmra.mxu1 %vm282_vm0, %v2553_v23  ;;  %1893 = vmatmul.mubr.msk.f32.gmra.mxu0 %vm282_vm0, %v2585_v27 }
 0x22d   : > { %1423 = vmatprep.mubr.f32.mxu1 %v2295_v6  ;;  %983 = vmatprep.mubr.f32.mxu0 %v2295_v6 }
 0x230   : > { %1979 = vmatmul.mubr.msk.f32.gmra.mxu1 %vm282_vm0, %v2569_v25  ;;  %1894 = vmatmul.mubr.msk.f32.gmra.mxu0 %vm282_vm0, %v2601_v29 }
 0x231   : > { %1429 = vmatprep.mubr.f32.mxu1 %v2295_v6  ;;  %989 = vmatprep.mubr.f32.mxu0 %v2295_v6 }
 0x234   : > { %1980 = vmatmul.mubr.msk.f32.gmra.mxu1 %vm282_vm0, %v2585_v27  ;;  %1895 = vmatmul.mubr.msk.f32.gmra.mxu0 %vm282_vm0, %v2617_v31 }
 0x235   : > { %1435 = vmatprep.mubr.f32.mxu1 %v2295_v6  ;;  %995 = vmatprep.mubr.f32.mxu0 %v2295_v6 }
 0x238   : > { %1981 = vmatmul.mubr.msk.f32.gmra.mxu1 %vm282_vm0, %v2601_v29  ;;  %1896 = vmatmul.mubr.msk.f32.gmra.mxu0 %vm282_vm0, %v2633_v33 }
 0x239   : > { %1441 = vmatprep.mubr.f32.mxu1 %v2295_v6  ;;  %1001 = vmatprep.mubr.f32.mxu0 %v2295_v6 }
 0x23c   : > { %1982 = vmatmul.mubr.msk.f32.gmra.mxu1 %vm282_vm0, %v2617_v31  ;;  %1897 = vmatmul.mubr.msk.f32.gmra.mxu0 %vm282_vm0, %v2647_v35 }
 0x23d   : > { %1447 = vmatprep.mubr.f32.mxu1 %v2295_v6  ;;  %1007 = vmatprep.mubr.f32.mxu0 %v2295_v6 }
 0x240   : > { %1983 = vmatmul.mubr.msk.f32.gmra.mxu1 %vm282_vm0, %v2633_v33  ;;  %1898 = vmatmul.mubr.msk.f32.gmra.mxu0 %vm282_vm0, %v2462_v12 }
 0x241   : > { %1453 = vmatprep.mubr.f32.mxu1 %v2295_v6  ;;  %1013 = vmatprep.mubr.f32.mxu0 %v2295_v6 }
 0x244   : > { %1984 = vmatmul.mubr.msk.f32.gmra.mxu1 %vm282_vm0, %v2647_v35  ;;  %1899 = vmatmul.mubr.msk.f32.gmra.mxu0 %vm282_vm0, %v2478_v14 }
 0x245   : > { %1459 = vmatprep.mubr.f32.mxu1 %v2295_v6  ;;  %1019 = vmatprep.mubr.f32.mxu0 %v2295_v6 }
 0x248   : > { %1985 = vmatmul.mubr.msk.f32.gmra.mxu1 %vm282_vm0, %v2462_v12  ;;  %1900 = vmatmul.mubr.msk.f32.gmra.mxu0 %vm282_vm0, %v2494_v16 }
 0x249   : > { %1465 = vmatprep.mubr.f32.mxu1 %v2295_v6  ;;  %1025 = vmatprep.mubr.f32.mxu0 %v2295_v6 }
 0x24c   : > { %1986 = vmatmul.mubr.msk.f32.gmra.mxu1 %vm282_vm0, %v2478_v14  ;;  %1901 = vmatmul.mubr.msk.f32.gmra.mxu0 %vm282_vm0, %v2510_v18 }
 0x24d   : > { %1471 = vmatprep.mubr.f32.mxu1 %v2295_v6  ;;  %1031 = vmatprep.mubr.f32.mxu0 %v2295_v6 }
 0x250   : > { %1987 = vmatmul.mubr.msk.f32.gmra.mxu1 %vm282_vm0, %v2494_v16  ;;  %1902 = vmatmul.mubr.msk.f32.gmra.mxu0 %vm282_vm0, %v2526_v20 }
 0x251   : > { %1477 = vmatprep.mubr.f32.mxu1 %v2295_v6  ;;  %1037 = vmatprep.mubr.f32.mxu0 %v2295_v6 }
 0x254   : > { %1988 = vmatmul.mubr.msk.f32.gmra.mxu1 %vm282_vm0, %v2510_v18  ;;  %1903 = vmatmul.mubr.msk.f32.gmra.mxu0 %vm282_vm0, %v2542_v22 }
 0x255   : > { %1483 = vmatprep.mubr.f32.mxu1 %v2295_v6  ;;  %1043 = vmatprep.mubr.f32.mxu0 %v2295_v6 }
 0x258   : > { %1989 = vmatmul.mubr.msk.f32.gmra.mxu1 %vm282_vm0, %v2526_v20  ;;  %1904 = vmatmul.mubr.msk.f32.gmra.mxu0 %vm282_vm0, %v2558_v24 }
 0x259   : > { %1489 = vmatprep.mubr.f32.mxu1 %v2295_v6  ;;  %1049 = vmatprep.mubr.f32.mxu0 %v2295_v6 }
 0x25c   : > { %1990 = vmatmul.mubr.msk.f32.gmra.mxu1 %vm282_vm0, %v2542_v22  ;;  %1905 = vmatmul.mubr.msk.f32.gmra.mxu0 %vm282_vm0, %v2574_v26 }
 0x25d   : > { %1495 = vmatprep.mubr.f32.mxu1 %v2295_v6  ;;  %1055 = vmatprep.mubr.f32.mxu0 %v2295_v6 }
 0x260   : > { %1991 = vmatmul.mubr.msk.f32.gmra.mxu1 %vm282_vm0, %v2558_v24  ;;  %1906 = vmatmul.mubr.msk.f32.gmra.mxu0 %vm282_vm0, %v2590_v28 }
 0x261   : > { %1501 = vmatprep.mubr.f32.mxu1 %v2295_v6  ;;  %1061 = vmatprep.mubr.f32.mxu0 %v2295_v6 }
 0x264   : > { %1992 = vmatmul.mubr.msk.f32.gmra.mxu1 %vm282_vm0, %v2574_v26  ;;  %1907 = vmatmul.mubr.msk.f32.gmra.mxu0 %vm282_vm0, %v2606_v30 }
 0x265   : > { %1507 = vmatprep.mubr.f32.mxu1 %v2295_v6  ;;  %1067 = vmatprep.mubr.f32.mxu0 %v2295_v6 }
 0x268   : > { %1993 = vmatmul.mubr.msk.f32.gmra.mxu1 %vm282_vm0, %v2590_v28  ;;  %1908 = vmatmul.mubr.msk.f32.gmra.mxu0 %vm282_vm0, %v2622_v32 }
 0x269   : > { %1513 = vmatprep.mubr.f32.mxu1 %v2295_v6  ;;  %1073 = vmatprep.mubr.f32.mxu0 %v2295_v6 }
 0x26c   : > { %1994 = vmatmul.mubr.msk.f32.gmra.mxu1 %vm282_vm0, %v2606_v30  ;;  %1909 = vmatmul.mubr.msk.f32.gmra.mxu0 %vm282_vm0, %v2638_v34 }
 0x26d   : > { %1519 = vmatprep.mubr.f32.mxu1 %v2295_v6  ;;  %1079 = vmatprep.mubr.f32.mxu0 %v2295_v6 }
 0x270   : > { %1995 = vmatmul.mubr.msk.f32.gmra.mxu1 %vm282_vm0, %v2622_v32  ;;  %1910 = vmatmul.mubr.msk.f32.gmra.mxu0 %vm282_vm0, %v2654_v36 }
 0x271   : > { %1525 = vmatprep.mubr.f32.mxu1 %v2295_v6  ;;  %1085 = vmatprep.mubr.f32.mxu0 %v2295_v6 }
 0x274   : > { %1996 = vmatmul.mubr.msk.f32.gmra.mxu1 %vm282_vm0, %v2638_v34  ;;  %1911 = vmatmul.mubr.msk.f32.gmra.mxu0 %vm282_vm0, %v2667_v40 }
 0x275   : > { %1531 = vmatprep.mubr.f32.mxu1 %v2295_v6  ;;  %1091 = vmatprep.mubr.f32.mxu0 %v2295_v6 }
 0x278   : > { %1997 = vmatmul.mubr.msk.f32.gmra.mxu1 %vm282_vm0, %v2654_v36  ;;  %1912 = vmatmul.mubr.msk.f32.gmra.mxu0 %vm282_vm0, %v2676_v41 }
 0x279   : > { %1537 = vmatprep.mubr.f32.mxu1 %v2295_v6 }
 0x27c   : > { %1998 = vmatmul.mubr.msk.f32.gmra.mxu1 %vm282_vm0, %v2667_v40 }
 0x27d   : > { %1543 = vmatprep.mubr.f32.mxu1 %v2295_v6 }
 0x280   : > { %1999 = vmatmul.mubr.msk.f32.gmra.mxu1 %vm282_vm0, %v2676_v41 }
 0x2cc   : > { %v931_v11 = vpop.f32.mrf.mxu0 }
 0x2cd   : > { %v1098_v12 = vmul.f32 3.8269808, %v931_v11 }
 0x2ce   : > { %v933_v13 = vpop.f32.mrf.mxu0 }
 0x2cf   : > { %v1154_v14 = vadd.f32 -1.7520971, %v1098_v12  ;;  %v1099_v15 = vmul.f32 3.8269808, %v933_v13 }
 0x2d0   : > { %v937_v16 = vpop.f32.mrf.mxu0 }
 0x2d1   : > { %1913 = vst [vmem:[%s2687_s21 + $0x1c0] sm:$0xff] %v1154_v14  ;;  %v1155_v17 = vadd.f32 -1.7520971, %v1099_v15  ;;  %v1100_v18 = vmul.f32 3.8269808, %v937_v16 }
 0x2d2   : > { %v939_v19 = vpop.f32.mrf.mxu0 }
 0x2d3   : > { %1914 = vst.msk [vmem:[%s2687_s21 + $0x1c8] sm:$0xff] %vm759_vm1, %v1155_v17  ;;  %v1156_v20 = vadd.f32 -1.7520971, %v1100_v18  ;;  %v1101_v21 = vmul.f32 3.8269808, %v939_v19 }
 0x2d4   : > { %v1383_v6 = vpop.f32.mrf.mxu1  ;;  %v943_v22 = vpop.f32.mrf.mxu0 }
 0x2d5   : > { %v1550_v23 = vmul.f32 3.6261168, %v1383_v6  ;;  %1915 = vst [vmem:[%s2687_s21 + $0x1d0] sm:$0xff] %v1156_v20  ;;  %v1157_v24 = vadd.f32 -1.7520971, %v1101_v21 }
 0x2d6   : > { %v1102_v25 = vmul.f32 3.8269808, %v943_v22  ;;  %v1385_v26 = vpop.f32.mrf.mxu1  ;;  %v945_v27 = vpop.f32.mrf.mxu0 }
 0x2d7   : > { %v1606_v28 = vadd.f32 -1.4802198, %v1550_v23  ;;  %v1551_v29 = vmul.f32 3.6261168, %v1385_v26  ;;  %1916 = vst.msk [vmem:[%s2687_s21 + $0x1d8] sm:$0xff] %vm759_vm1, %v1157_v24 }
 0x2d8   : > { %v1158_v30 = vadd.f32 -1.7520971, %v1102_v25  ;;  %v1389_v31 = vpop.f32.mrf.mxu1  ;;  %v1103_v32 = vmul.f32 3.8269808, %v945_v27  ;;  %v949_v33 = vpop.f32.mrf.mxu0 }
 0x2d9   : > { %2000 = vst [vmem:[%s2687_s21 + $0x380] sm:$0xff] %v1606_v28  ;;  %v1607_v34 = vadd.f32 -1.4802198, %v1551_v29  ;;  %v1552_v35 = vmul.f32 3.6261168, %v1389_v31 }
 0x2da   : > { %1917 = vst [vmem:[%s2687_s21 + $0x1e0] sm:$0xff] %v1158_v30  ;;  %v1104_v36 = vmul.f32 3.8269808, %v949_v33  ;;  %v1391_v40 = vpop.f32.mrf.mxu1  ;;  %v1159_v41 = vadd.f32 -1.7520971, %v1103_v32  ;;  %v951_v46 = vpop.f32.mrf.mxu0 }
 0x2db   : > { %2001 = vst.msk [vmem:[%s2687_s21 + $0x388] sm:$0xff] %vm759_vm1, %v1607_v34  ;;  %v1608_v47 = vadd.f32 -1.4802198, %v1552_v35  ;;  %v1553_v48 = vmul.f32 3.6261168, %v1391_v40 }
 0x2dc   : > { %v1160_v49 = vadd.f32 -1.7520971, %v1104_v36  ;;  %v1395_v50 = vpop.f32.mrf.mxu1  ;;  %1918 = vst.msk [vmem:[%s2687_s21 + $0x1e8] sm:$0xff] %vm759_vm1, %v1159_v41  ;;  %v1105_v51 = vmul.f32 3.8269808, %v951_v46  ;;  %v955_v52 = vpop.f32.mrf.mxu0 }
 0x2dd   : > { %2002 = vst [vmem:[%s2687_s21 + $0x390] sm:$0xff] %v1608_v47  ;;  %v1609_v53 = vadd.f32 -1.4802198, %v1553_v48  ;;  %v1554_v54 = vmul.f32 3.6261168, %v1395_v50 }
 0x2de   : > { %1919 = vst [vmem:[%s2687_s21 + $0x1f0] sm:$0xff] %v1160_v49  ;;  %v1106_v55 = vmul.f32 3.8269808, %v955_v52  ;;  %v1397_v56 = vpop.f32.mrf.mxu1  ;;  %v1161_v57 = vadd.f32 -1.7520971, %v1105_v51  ;;  %v957_v58 = vpop.f32.mrf.mxu0 }
 0x2df   : > { %2003 = vst.msk [vmem:[%s2687_s21 + $0x398] sm:$0xff] %vm759_vm1, %v1609_v53  ;;  %v1610_v59 = vadd.f32 -1.4802198, %v1554_v54  ;;  %v1555_v60 = vmul.f32 3.6261168, %v1397_v56 }
 0x2e0   : > { %v1162_v61 = vadd.f32 -1.7520971, %v1106_v55  ;;  %v1401_v62 = vpop.f32.mrf.mxu1  ;;  %1920 = vst.msk [vmem:[%s2687_s21 + $0x1f8] sm:$0xff] %vm759_vm1, %v1161_v57  ;;  %v1107_v63 = vmul.f32 3.8269808, %v957_v58  ;;  %v961_v0 = vpop.f32.mrf.mxu0 }
 0x2e1   : > { %2004 = vst [vmem:[%s2687_s21 + $0x3a0] sm:$0xff] %v1610_v59  ;;  %v1611_v1 = vadd.f32 -1.4802198, %v1555_v60  ;;  %v1556_v2 = vmul.f32 3.6261168, %v1401_v62 }
 0x2e2   : > { %1921 = vst [vmem:[%s2687_s21 + $0x200] sm:$0xff] %v1162_v61  ;;  %v1108_v3 = vmul.f32 3.8269808, %v961_v0  ;;  %v1403_v4 = vpop.f32.mrf.mxu1  ;;  %v1163_v5 = vadd.f32 -1.7520971, %v1107_v63  ;;  %v963_v7 = vpop.f32.mrf.mxu0 }
 0x2e3   : > { %2005 = vst.msk [vmem:[%s2687_s21 + $0x3a8] sm:$0xff] %vm759_vm1, %v1611_v1  ;;  %v1612_v8 = vadd.f32 -1.4802198, %v1556_v2  ;;  %v1557_v9 = vmul.f32 3.6261168, %v1403_v4 }
 0x2e4   : > { %v1164_v10 = vadd.f32 -1.7520971, %v1108_v3  ;;  %v1407_v37 = vpop.f32.mrf.mxu1  ;;  %1922 = vst.msk [vmem:[%s2687_s21 + $0x208] sm:$0xff] %vm759_vm1, %v1163_v5  ;;  %v1109_v38 = vmul.f32 3.8269808, %v963_v7  ;;  %v967_v39 = vpop.f32.mrf.mxu0 }
 0x2e5   : > { %2006 = vst [vmem:[%s2687_s21 + $0x3b0] sm:$0xff] %v1612_v8  ;;  %v1613_v42 = vadd.f32 -1.4802198, %v1557_v9  ;;  %v1558_v43 = vmul.f32 3.6261168, %v1407_v37 }
 0x2e6   : > { %1923 = vst [vmem:[%s2687_s21 + $0x210] sm:$0xff] %v1164_v10  ;;  %v1110_v44 = vmul.f32 3.8269808, %v967_v39  ;;  %v1409_v45 = vpop.f32.mrf.mxu1  ;;  %v1165_v11 = vadd.f32 -1.7520971, %v1109_v38  ;;  %v969_v12 = vpop.f32.mrf.mxu0 }
 0x2e7   : > { %2007 = vst.msk [vmem:[%s2687_s21 + $0x3b8] sm:$0xff] %vm759_vm1, %v1613_v42  ;;  %v1614_v13 = vadd.f32 -1.4802198, %v1558_v43  ;;  %v1559_v14 = vmul.f32 3.6261168, %v1409_v45 }
 0x2e8   : > { %v1166_v15 = vadd.f32 -1.7520971, %v1110_v44  ;;  %v1413_v16 = vpop.f32.mrf.mxu1  ;;  %1924 = vst.msk [vmem:[%s2687_s21 + $0x218] sm:$0xff] %vm759_vm1, %v1165_v11  ;;  %v1111_v17 = vmul.f32 3.8269808, %v969_v12  ;;  %v973_v18 = vpop.f32.mrf.mxu0 }
 0x2e9   : > { %2008 = vst [vmem:[%s2687_s21 + $0x3c0] sm:$0xff] %v1614_v13  ;;  %v1615_v19 = vadd.f32 -1.4802198, %v1559_v14  ;;  %v1560_v20 = vmul.f32 3.6261168, %v1413_v16 }
 0x2ea   : > { %1925 = vst [vmem:[%s2687_s21 + $0x220] sm:$0xff] %v1166_v15  ;;  %v1112_v21 = vmul.f32 3.8269808, %v973_v18  ;;  %v1415_v6 = vpop.f32.mrf.mxu1  ;;  %v1167_v22 = vadd.f32 -1.7520971, %v1111_v17  ;;  %v975_v23 = vpop.f32.mrf.mxu0 }
 0x2eb   : > { %2009 = vst.msk [vmem:[%s2687_s21 + $0x3c8] sm:$0xff] %vm759_vm1, %v1615_v19  ;;  %v1616_v24 = vadd.f32 -1.4802198, %v1560_v20  ;;  %v1561_v25 = vmul.f32 3.6261168, %v1415_v6 }
 0x2ec   : > { %v1168_v26 = vadd.f32 -1.7520971, %v1112_v21  ;;  %v1419_v27 = vpop.f32.mrf.mxu1  ;;  %1926 = vst.msk [vmem:[%s2687_s21 + $0x228] sm:$0xff] %vm759_vm1, %v1167_v22  ;;  %v1113_v28 = vmul.f32 3.8269808, %v975_v23  ;;  %v979_v29 = vpop.f32.mrf.mxu0 }
 0x2ed   : > { %2010 = vst [vmem:[%s2687_s21 + $0x3d0] sm:$0xff] %v1616_v24  ;;  %v1617_v30 = vadd.f32 -1.4802198, %v1561_v25  ;;  %v1562_v31 = vmul.f32 3.6261168, %v1419_v27 }
 0x2ee   : > { %1927 = vst [vmem:[%s2687_s21 + $0x230] sm:$0xff] %v1168_v26  ;;  %v1114_v32 = vmul.f32 3.8269808, %v979_v29  ;;  %v1421_v33 = vpop.f32.mrf.mxu1  ;;  %v1169_v34 = vadd.f32 -1.7520971, %v1113_v28  ;;  %v981_v35 = vpop.f32.mrf.mxu0 }
 0x2ef   : > { %2011 = vst.msk [vmem:[%s2687_s21 + $0x3d8] sm:$0xff] %vm759_vm1, %v1617_v30  ;;  %v1618_v36 = vadd.f32 -1.4802198, %v1562_v31  ;;  %v1563_v40 = vmul.f32 3.6261168, %v1421_v33 }
 0x2f0   : > { %v1170_v41 = vadd.f32 -1.7520971, %v1114_v32  ;;  %v1425_v46 = vpop.f32.mrf.mxu1  ;;  %1928 = vst.msk [vmem:[%s2687_s21 + $0x238] sm:$0xff] %vm759_vm1, %v1169_v34  ;;  %v1115_v47 = vmul.f32 3.8269808, %v981_v35  ;;  %v985_v48 = vpop.f32.mrf.mxu0 }
 0x2f1   : > { %2012 = vst [vmem:[%s2687_s21 + $0x3e0] sm:$0xff] %v1618_v36  ;;  %v1619_v49 = vadd.f32 -1.4802198, %v1563_v40  ;;  %v1564_v50 = vmul.f32 3.6261168, %v1425_v46 }
 0x2f2   : > { %1929 = vst [vmem:[%s2687_s21 + $0x240] sm:$0xff] %v1170_v41  ;;  %v1116_v51 = vmul.f32 3.8269808, %v985_v48  ;;  %v1427_v52 = vpop.f32.mrf.mxu1  ;;  %v1171_v53 = vadd.f32 -1.7520971, %v1115_v47  ;;  %v987_v54 = vpop.f32.mrf.mxu0 }
 0x2f3   : > { %2013 = vst.msk [vmem:[%s2687_s21 + $0x3e8] sm:$0xff] %vm759_vm1, %v1619_v49  ;;  %v1620_v55 = vadd.f32 -1.4802198, %v1564_v50  ;;  %v1565_v56 = vmul.f32 3.6261168, %v1427_v52 }
 0x2f4   : > { %v1172_v57 = vadd.f32 -1.7520971, %v1116_v51  ;;  %v1431_v58 = vpop.f32.mrf.mxu1  ;;  %1930 = vst.msk [vmem:[%s2687_s21 + $0x248] sm:$0xff] %vm759_vm1, %v1171_v53  ;;  %v1117_v59 = vmul.f32 3.8269808, %v987_v54  ;;  %v991_v60 = vpop.f32.mrf.mxu0 }
 0x2f5   : > { %2014 = vst [vmem:[%s2687_s21 + $0x3f0] sm:$0xff] %v1620_v55  ;;  %v1621_v61 = vadd.f32 -1.4802198, %v1565_v56  ;;  %v1566_v62 = vmul.f32 3.6261168, %v1431_v58 }
 0x2f6   : > { %1931 = vst [vmem:[%s2687_s21 + $0x250] sm:$0xff] %v1172_v57  ;;  %v1118_v63 = vmul.f32 3.8269808, %v991_v60  ;;  %v1433_v0 = vpop.f32.mrf.mxu1  ;;  %v1173_v1 = vadd.f32 -1.7520971, %v1117_v59  ;;  %v993_v2 = vpop.f32.mrf.mxu0 }
 0x2f7   : > { %2015 = vst.msk [vmem:[%s2687_s21 + $0x3f8] sm:$0xff] %vm759_vm1, %v1621_v61  ;;  %v1622_v3 = vadd.f32 -1.4802198, %v1566_v62  ;;  %v1567_v4 = vmul.f32 3.6261168, %v1433_v0 }
 0x2f8   : > { %v1174_v5 = vadd.f32 -1.7520971, %v1118_v63  ;;  %v1437_v7 = vpop.f32.mrf.mxu1  ;;  %1932 = vst.msk [vmem:[%s2687_s21 + $0x258] sm:$0xff] %vm759_vm1, %v1173_v1  ;;  %v1119_v8 = vmul.f32 3.8269808, %v993_v2  ;;  %v997_v9 = vpop.f32.mrf.mxu0 }
 0x2f9   : > { %2016 = vst [vmem:[%s2687_s21 + $0x400] sm:$0xff] %v1622_v3  ;;  %v1623_v10 = vadd.f32 -1.4802198, %v1567_v4  ;;  %v1568_v37 = vmul.f32 3.6261168, %v1437_v7 }
 0x2fa   : > { %1933 = vst [vmem:[%s2687_s21 + $0x260] sm:$0xff] %v1174_v5  ;;  %v1120_v38 = vmul.f32 3.8269808, %v997_v9  ;;  %v1439_v39 = vpop.f32.mrf.mxu1  ;;  %v1175_v42 = vadd.f32 -1.7520971, %v1119_v8  ;;  %v999_v43 = vpop.f32.mrf.mxu0 }
 0x2fb   : > { %2017 = vst.msk [vmem:[%s2687_s21 + $0x408] sm:$0xff] %vm759_vm1, %v1623_v10  ;;  %v1624_v44 = vadd.f32 -1.4802198, %v1568_v37  ;;  %v1569_v45 = vmul.f32 3.6261168, %v1439_v39 }
 0x2fc   : > { %v1176_v11 = vadd.f32 -1.7520971, %v1120_v38  ;;  %v1443_v12 = vpop.f32.mrf.mxu1  ;;  %1934 = vst.msk [vmem:[%s2687_s21 + $0x268] sm:$0xff] %vm759_vm1, %v1175_v42  ;;  %v1121_v13 = vmul.f32 3.8269808, %v999_v43  ;;  %v1003_v14 = vpop.f32.mrf.mxu0 }
 0x2fd   : > { %2018 = vst [vmem:[%s2687_s21 + $0x410] sm:$0xff] %v1624_v44  ;;  %v1625_v15 = vadd.f32 -1.4802198, %v1569_v45  ;;  %v1570_v16 = vmul.f32 3.6261168, %v1443_v12 }
 0x2fe   : > { %1935 = vst [vmem:[%s2687_s21 + $0x270] sm:$0xff] %v1176_v11  ;;  %v1122_v17 = vmul.f32 3.8269808, %v1003_v14  ;;  %v1445_v18 = vpop.f32.mrf.mxu1  ;;  %v1177_v19 = vadd.f32 -1.7520971, %v1121_v13  ;;  %v1005_v20 = vpop.f32.mrf.mxu0 }
 0x2ff   : > { %2019 = vst.msk [vmem:[%s2687_s21 + $0x418] sm:$0xff] %vm759_vm1, %v1625_v15  ;;  %v1626_v21 = vadd.f32 -1.4802198, %v1570_v16  ;;  %v1571_v6 = vmul.f32 3.6261168, %v1445_v18 }
 0x300   : > { %v1178_v22 = vadd.f32 -1.7520971, %v1122_v17  ;;  %v1449_v23 = vpop.f32.mrf.mxu1  ;;  %1936 = vst.msk [vmem:[%s2687_s21 + $0x278] sm:$0xff] %vm759_vm1, %v1177_v19  ;;  %v1123_v24 = vmul.f32 3.8269808, %v1005_v20  ;;  %v1009_v25 = vpop.f32.mrf.mxu0 }
 0x301   : > { %2020 = vst [vmem:[%s2687_s21 + $0x420] sm:$0xff] %v1626_v21  ;;  %v1627_v26 = vadd.f32 -1.4802198, %v1571_v6  ;;  %v1572_v27 = vmul.f32 3.6261168, %v1449_v23 }
 0x302   : > { %1937 = vst [vmem:[%s2687_s21 + $0x280] sm:$0xff] %v1178_v22  ;;  %v1124_v28 = vmul.f32 3.8269808, %v1009_v25  ;;  %v1451_v29 = vpop.f32.mrf.mxu1  ;;  %v1179_v30 = vadd.f32 -1.7520971, %v1123_v24  ;;  %v1011_v31 = vpop.f32.mrf.mxu0 }
 0x303   : > { %2021 = vst.msk [vmem:[%s2687_s21 + $0x428] sm:$0xff] %vm759_vm1, %v1627_v26  ;;  %v1628_v32 = vadd.f32 -1.4802198, %v1572_v27  ;;  %v1573_v33 = vmul.f32 3.6261168, %v1451_v29 }
 0x304   : > { %v1180_v34 = vadd.f32 -1.7520971, %v1124_v28  ;;  %v1455_v35 = vpop.f32.mrf.mxu1  ;;  %1938 = vst.msk [vmem:[%s2687_s21 + $0x288] sm:$0xff] %vm759_vm1, %v1179_v30  ;;  %v1125_v36 = vmul.f32 3.8269808, %v1011_v31  ;;  %v1015_v40 = vpop.f32.mrf.mxu0 }
 0x305   : > { %2022 = vst [vmem:[%s2687_s21 + $0x430] sm:$0xff] %v1628_v32  ;;  %v1629_v41 = vadd.f32 -1.4802198, %v1573_v33  ;;  %v1574_v46 = vmul.f32 3.6261168, %v1455_v35 }
 0x306   : > { %1939 = vst [vmem:[%s2687_s21 + $0x290] sm:$0xff] %v1180_v34  ;;  %v1126_v47 = vmul.f32 3.8269808, %v1015_v40  ;;  %v1457_v48 = vpop.f32.mrf.mxu1  ;;  %v1181_v49 = vadd.f32 -1.7520971, %v1125_v36  ;;  %v1017_v50 = vpop.f32.mrf.mxu0 }
 0x307   : > { %2023 = vst.msk [vmem:[%s2687_s21 + $0x438] sm:$0xff] %vm759_vm1, %v1629_v41  ;;  %v1630_v51 = vadd.f32 -1.4802198, %v1574_v46  ;;  %v1575_v52 = vmul.f32 3.6261168, %v1457_v48 }
 0x308   : > { %v1182_v53 = vadd.f32 -1.7520971, %v1126_v47  ;;  %v1461_v54 = vpop.f32.mrf.mxu1  ;;  %1940 = vst.msk [vmem:[%s2687_s21 + $0x298] sm:$0xff] %vm759_vm1, %v1181_v49  ;;  %v1127_v55 = vmul.f32 3.8269808, %v1017_v50  ;;  %v1021_v56 = vpop.f32.mrf.mxu0 }
 0x309   : > { %2024 = vst [vmem:[%s2687_s21 + $0x440] sm:$0xff] %v1630_v51  ;;  %v1631_v57 = vadd.f32 -1.4802198, %v1575_v52  ;;  %v1576_v58 = vmul.f32 3.6261168, %v1461_v54 }
 0x30a   : > { %1941 = vst [vmem:[%s2687_s21 + $0x2a0] sm:$0xff] %v1182_v53  ;;  %v1128_v59 = vmul.f32 3.8269808, %v1021_v56  ;;  %v1463_v60 = vpop.f32.mrf.mxu1  ;;  %v1183_v61 = vadd.f32 -1.7520971, %v1127_v55  ;;  %v1023_v62 = vpop.f32.mrf.mxu0 }
 0x30b   : > { %2025 = vst.msk [vmem:[%s2687_s21 + $0x448] sm:$0xff] %vm759_vm1, %v1631_v57  ;;  %v1632_v63 = vadd.f32 -1.4802198, %v1576_v58  ;;  %v1577_v0 = vmul.f32 3.6261168, %v1463_v60 }
 0x30c   : > { %v1184_v1 = vadd.f32 -1.7520971, %v1128_v59  ;;  %v1467_v2 = vpop.f32.mrf.mxu1  ;;  %1942 = vst.msk [vmem:[%s2687_s21 + $0x2a8] sm:$0xff] %vm759_vm1, %v1183_v61  ;;  %v1129_v3 = vmul.f32 3.8269808, %v1023_v62  ;;  %v1027_v4 = vpop.f32.mrf.mxu0 }
 0x30d   : > { %2026 = vst [vmem:[%s2687_s21 + $0x450] sm:$0xff] %v1632_v63  ;;  %v1633_v5 = vadd.f32 -1.4802198, %v1577_v0  ;;  %v1578_v7 = vmul.f32 3.6261168, %v1467_v2 }
 0x30e   : > { %1943 = vst [vmem:[%s2687_s21 + $0x2b0] sm:$0xff] %v1184_v1  ;;  %v1130_v8 = vmul.f32 3.8269808, %v1027_v4  ;;  %v1469_v9 = vpop.f32.mrf.mxu1  ;;  %v1185_v10 = vadd.f32 -1.7520971, %v1129_v3  ;;  %v1029_v37 = vpop.f32.mrf.mxu0 }
 0x30f   : > { %2027 = vst.msk [vmem:[%s2687_s21 + $0x458] sm:$0xff] %vm759_vm1, %v1633_v5  ;;  %v1634_v38 = vadd.f32 -1.4802198, %v1578_v7  ;;  %v1579_v39 = vmul.f32 3.6261168, %v1469_v9 }
 0x310   : > { %v1186_v42 = vadd.f32 -1.7520971, %v1130_v8  ;;  %v1473_v43 = vpop.f32.mrf.mxu1  ;;  %1944 = vst.msk [vmem:[%s2687_s21 + $0x2b8] sm:$0xff] %vm759_vm1, %v1185_v10  ;;  %v1131_v44 = vmul.f32 3.8269808, %v1029_v37  ;;  %v1033_v45 = vpop.f32.mrf.mxu0 }
 0x311   : > { %2028 = vst [vmem:[%s2687_s21 + $0x460] sm:$0xff] %v1634_v38  ;;  %v1635_v11 = vadd.f32 -1.4802198, %v1579_v39  ;;  %v1580_v12 = vmul.f32 3.6261168, %v1473_v43 }
 0x312   : > { %1945 = vst [vmem:[%s2687_s21 + $0x2c0] sm:$0xff] %v1186_v42  ;;  %v1132_v13 = vmul.f32 3.8269808, %v1033_v45  ;;  %v1475_v14 = vpop.f32.mrf.mxu1  ;;  %v1187_v15 = vadd.f32 -1.7520971, %v1131_v44  ;;  %v1035_v16 = vpop.f32.mrf.mxu0 }
 0x313   : > { %2029 = vst.msk [vmem:[%s2687_s21 + $0x468] sm:$0xff] %vm759_vm1, %v1635_v11  ;;  %v1636_v17 = vadd.f32 -1.4802198, %v1580_v12  ;;  %v1581_v18 = vmul.f32 3.6261168, %v1475_v14 }
 0x314   : > { %v1188_v19 = vadd.f32 -1.7520971, %v1132_v13  ;;  %v1479_v20 = vpop.f32.mrf.mxu1  ;;  %1946 = vst.msk [vmem:[%s2687_s21 + $0x2c8] sm:$0xff] %vm759_vm1, %v1187_v15  ;;  %v1133_v21 = vmul.f32 3.8269808, %v1035_v16  ;;  %v1039_v6 = vpop.f32.mrf.mxu0 }
 0x315   : > { %2030 = vst [vmem:[%s2687_s21 + $0x470] sm:$0xff] %v1636_v17  ;;  %v1637_v22 = vadd.f32 -1.4802198, %v1581_v18  ;;  %v1582_v23 = vmul.f32 3.6261168, %v1479_v20 }
 0x316   : > { %1947 = vst [vmem:[%s2687_s21 + $0x2d0] sm:$0xff] %v1188_v19  ;;  %v1134_v24 = vmul.f32 3.8269808, %v1039_v6  ;;  %v1481_v25 = vpop.f32.mrf.mxu1  ;;  %v1189_v26 = vadd.f32 -1.7520971, %v1133_v21  ;;  %v1041_v27 = vpop.f32.mrf.mxu0 }
 0x317   : > { %2031 = vst.msk [vmem:[%s2687_s21 + $0x478] sm:$0xff] %vm759_vm1, %v1637_v22  ;;  %v1638_v28 = vadd.f32 -1.4802198, %v1582_v23  ;;  %v1583_v29 = vmul.f32 3.6261168, %v1481_v25 }
 0x318   : > { %v1190_v30 = vadd.f32 -1.7520971, %v1134_v24  ;;  %v1485_v31 = vpop.f32.mrf.mxu1  ;;  %1948 = vst.msk [vmem:[%s2687_s21 + $0x2d8] sm:$0xff] %vm759_vm1, %v1189_v26  ;;  %v1135_v32 = vmul.f32 3.8269808, %v1041_v27  ;;  %v1045_v33 = vpop.f32.mrf.mxu0 }
 0x319   : > { %2032 = vst [vmem:[%s2687_s21 + $0x480] sm:$0xff] %v1638_v28  ;;  %v1639_v34 = vadd.f32 -1.4802198, %v1583_v29  ;;  %v1584_v35 = vmul.f32 3.6261168, %v1485_v31 }
 0x31a   : > { %1949 = vst [vmem:[%s2687_s21 + $0x2e0] sm:$0xff] %v1190_v30  ;;  %v1136_v36 = vmul.f32 3.8269808, %v1045_v33  ;;  %v1487_v40 = vpop.f32.mrf.mxu1  ;;  %v1191_v41 = vadd.f32 -1.7520971, %v1135_v32  ;;  %v1047_v46 = vpop.f32.mrf.mxu0 }
 0x31b   : > { %2033 = vst.msk [vmem:[%s2687_s21 + $0x488] sm:$0xff] %vm759_vm1, %v1639_v34  ;;  %v1640_v47 = vadd.f32 -1.4802198, %v1584_v35  ;;  %v1585_v48 = vmul.f32 3.6261168, %v1487_v40 }
 0x31c   : > { %v1192_v49 = vadd.f32 -1.7520971, %v1136_v36  ;;  %v1491_v50 = vpop.f32.mrf.mxu1  ;;  %1950 = vst.msk [vmem:[%s2687_s21 + $0x2e8] sm:$0xff] %vm759_vm1, %v1191_v41  ;;  %v1137_v51 = vmul.f32 3.8269808, %v1047_v46  ;;  %v1051_v52 = vpop.f32.mrf.mxu0 }
 0x31d   : > { %2034 = vst [vmem:[%s2687_s21 + $0x490] sm:$0xff] %v1640_v47  ;;  %v1641_v53 = vadd.f32 -1.4802198, %v1585_v48  ;;  %v1586_v54 = vmul.f32 3.6261168, %v1491_v50 }
 0x31e   : > { %1951 = vst [vmem:[%s2687_s21 + $0x2f0] sm:$0xff] %v1192_v49  ;;  %v1138_v55 = vmul.f32 3.8269808, %v1051_v52  ;;  %v1493_v56 = vpop.f32.mrf.mxu1  ;;  %v1193_v57 = vadd.f32 -1.7520971, %v1137_v51  ;;  %v1053_v58 = vpop.f32.mrf.mxu0 }
 0x31f   : > { %2035 = vst.msk [vmem:[%s2687_s21 + $0x498] sm:$0xff] %vm759_vm1, %v1641_v53  ;;  %v1642_v59 = vadd.f32 -1.4802198, %v1586_v54  ;;  %v1587_v60 = vmul.f32 3.6261168, %v1493_v56 }
 0x320   : > { %v1194_v61 = vadd.f32 -1.7520971, %v1138_v55  ;;  %v1497_v62 = vpop.f32.mrf.mxu1  ;;  %1952 = vst.msk [vmem:[%s2687_s21 + $0x2f8] sm:$0xff] %vm759_vm1, %v1193_v57  ;;  %v1139_v63 = vmul.f32 3.8269808, %v1053_v58  ;;  %v1057_v0 = vpop.f32.mrf.mxu0 }
 0x321   : > { %2036 = vst [vmem:[%s2687_s21 + $0x4a0] sm:$0xff] %v1642_v59  ;;  %v1643_v1 = vadd.f32 -1.4802198, %v1587_v60  ;;  %v1588_v2 = vmul.f32 3.6261168, %v1497_v62 }
 0x322   : > { %1953 = vst [vmem:[%s2687_s21 + $0x300] sm:$0xff] %v1194_v61  ;;  %v1140_v3 = vmul.f32 3.8269808, %v1057_v0  ;;  %v1499_v4 = vpop.f32.mrf.mxu1  ;;  %v1195_v5 = vadd.f32 -1.7520971, %v1139_v63  ;;  %v1059_v7 = vpop.f32.mrf.mxu0 }
 0x323   : > { %2037 = vst.msk [vmem:[%s2687_s21 + $0x4a8] sm:$0xff] %vm759_vm1, %v1643_v1  ;;  %v1644_v8 = vadd.f32 -1.4802198, %v1588_v2  ;;  %v1589_v9 = vmul.f32 3.6261168, %v1499_v4 }
 0x324   : > { %v1196_v10 = vadd.f32 -1.7520971, %v1140_v3  ;;  %v1503_v37 = vpop.f32.mrf.mxu1  ;;  %1954 = vst.msk [vmem:[%s2687_s21 + $0x308] sm:$0xff] %vm759_vm1, %v1195_v5  ;;  %v1141_v38 = vmul.f32 3.8269808, %v1059_v7  ;;  %v1063_v39 = vpop.f32.mrf.mxu0 }
 0x325   : > { %2038 = vst [vmem:[%s2687_s21 + $0x4b0] sm:$0xff] %v1644_v8  ;;  %v1645_v42 = vadd.f32 -1.4802198, %v1589_v9  ;;  %v1590_v43 = vmul.f32 3.6261168, %v1503_v37 }
 0x326   : > { %1955 = vst [vmem:[%s2687_s21 + $0x310] sm:$0xff] %v1196_v10  ;;  %v1142_v44 = vmul.f32 3.8269808, %v1063_v39  ;;  %v1505_v45 = vpop.f32.mrf.mxu1  ;;  %v1197_v11 = vadd.f32 -1.7520971, %v1141_v38  ;;  %v1065_v12 = vpop.f32.mrf.mxu0 }
 0x327   : > { %2039 = vst.msk [vmem:[%s2687_s21 + $0x4b8] sm:$0xff] %vm759_vm1, %v1645_v42  ;;  %v1646_v13 = vadd.f32 -1.4802198, %v1590_v43  ;;  %v1591_v14 = vmul.f32 3.6261168, %v1505_v45 }
 0x328   : > { %v1198_v15 = vadd.f32 -1.7520971, %v1142_v44  ;;  %v1509_v16 = vpop.f32.mrf.mxu1  ;;  %1956 = vst.msk [vmem:[%s2687_s21 + $0x318] sm:$0xff] %vm759_vm1, %v1197_v11  ;;  %v1143_v17 = vmul.f32 3.8269808, %v1065_v12  ;;  %v1069_v18 = vpop.f32.mrf.mxu0 }
 0x329   : > { %2040 = vst [vmem:[%s2687_s21 + $0x4c0] sm:$0xff] %v1646_v13  ;;  %v1647_v19 = vadd.f32 -1.4802198, %v1591_v14  ;;  %v1592_v20 = vmul.f32 3.6261168, %v1509_v16 }
 0x32a   : > { %1957 = vst [vmem:[%s2687_s21 + $0x320] sm:$0xff] %v1198_v15  ;;  %v1144_v21 = vmul.f32 3.8269808, %v1069_v18  ;;  %v1511_v6 = vpop.f32.mrf.mxu1  ;;  %v1199_v22 = vadd.f32 -1.7520971, %v1143_v17  ;;  %v1071_v23 = vpop.f32.mrf.mxu0 }
 0x32b   : > { %2041 = vst.msk [vmem:[%s2687_s21 + $0x4c8] sm:$0xff] %vm759_vm1, %v1647_v19  ;;  %v1648_v24 = vadd.f32 -1.4802198, %v1592_v20  ;;  %v1593_v25 = vmul.f32 3.6261168, %v1511_v6 }
 0x32c   : > { %v1200_v26 = vadd.f32 -1.7520971, %v1144_v21  ;;  %v1515_v27 = vpop.f32.mrf.mxu1  ;;  %1958 = vst.msk [vmem:[%s2687_s21 + $0x328] sm:$0xff] %vm759_vm1, %v1199_v22  ;;  %v1145_v28 = vmul.f32 3.8269808, %v1071_v23  ;;  %v1075_v29 = vpop.f32.mrf.mxu0 }
 0x32d   : > { %2042 = vst [vmem:[%s2687_s21 + $0x4d0] sm:$0xff] %v1648_v24  ;;  %v1649_v30 = vadd.f32 -1.4802198, %v1593_v25  ;;  %v1594_v31 = vmul.f32 3.6261168, %v1515_v27 }
 0x32e   : > { %1959 = vst [vmem:[%s2687_s21 + $0x330] sm:$0xff] %v1200_v26  ;;  %v1146_v32 = vmul.f32 3.8269808, %v1075_v29  ;;  %v1517_v33 = vpop.f32.mrf.mxu1  ;;  %v1201_v34 = vadd.f32 -1.7520971, %v1145_v28  ;;  %v1077_v35 = vpop.f32.mrf.mxu0 }
 0x32f   : > { %2043 = vst.msk [vmem:[%s2687_s21 + $0x4d8] sm:$0xff] %vm759_vm1, %v1649_v30  ;;  %v1650_v36 = vadd.f32 -1.4802198, %v1594_v31  ;;  %v1595_v40 = vmul.f32 3.6261168, %v1517_v33 }
 0x330   : > { %v1202_v41 = vadd.f32 -1.7520971, %v1146_v32  ;;  %v1521_v46 = vpop.f32.mrf.mxu1  ;;  %1960 = vst.msk [vmem:[%s2687_s21 + $0x338] sm:$0xff] %vm759_vm1, %v1201_v34  ;;  %v1147_v47 = vmul.f32 3.8269808, %v1077_v35  ;;  %v1081_v48 = vpop.f32.mrf.mxu0 }
 0x331   : > { %2044 = vst [vmem:[%s2687_s21 + $0x4e0] sm:$0xff] %v1650_v36  ;;  %v1651_v49 = vadd.f32 -1.4802198, %v1595_v40  ;;  %v1596_v50 = vmul.f32 3.6261168, %v1521_v46 }
 0x332   : > { %1961 = vst [vmem:[%s2687_s21 + $0x340] sm:$0xff] %v1202_v41  ;;  %v1148_v51 = vmul.f32 3.8269808, %v1081_v48  ;;  %v1523_v52 = vpop.f32.mrf.mxu1  ;;  %v1203_v53 = vadd.f32 -1.7520971, %v1147_v47  ;;  %v1083_v54 = vpop.f32.mrf.mxu0 }
 0x333   : > { %2045 = vst.msk [vmem:[%s2687_s21 + $0x4e8] sm:$0xff] %vm759_vm1, %v1651_v49  ;;  %v1652_v55 = vadd.f32 -1.4802198, %v1596_v50  ;;  %v1597_v56 = vmul.f32 3.6261168, %v1523_v52 }
 0x334   : > { %v1204_v57 = vadd.f32 -1.7520971, %v1148_v51  ;;  %v1527_v58 = vpop.f32.mrf.mxu1  ;;  %1962 = vst.msk [vmem:[%s2687_s21 + $0x348] sm:$0xff] %vm759_vm1, %v1203_v53  ;;  %v1149_v59 = vmul.f32 3.8269808, %v1083_v54  ;;  %v1087_v60 = vpop.f32.mrf.mxu0 }
 0x335   : > { %2046 = vst [vmem:[%s2687_s21 + $0x4f0] sm:$0xff] %v1652_v55  ;;  %v1653_v61 = vadd.f32 -1.4802198, %v1597_v56  ;;  %v1598_v62 = vmul.f32 3.6261168, %v1527_v58 }
 0x336   : > { %1963 = vst [vmem:[%s2687_s21 + $0x350] sm:$0xff] %v1204_v57  ;;  %v1150_v63 = vmul.f32 3.8269808, %v1087_v60  ;;  %v1529_v0 = vpop.f32.mrf.mxu1  ;;  %v1205_v1 = vadd.f32 -1.7520971, %v1149_v59  ;;  %v1089_v2 = vpop.f32.mrf.mxu0 }
 0x337   : > { %2047 = vst.msk [vmem:[%s2687_s21 + $0x4f8] sm:$0xff] %vm759_vm1, %v1653_v61  ;;  %v1654_v3 = vadd.f32 -1.4802198, %v1598_v62  ;;  %v1599_v4 = vmul.f32 3.6261168, %v1529_v0 }
 0x338   : > { %v1206_v5 = vadd.f32 -1.7520971, %v1150_v63  ;;  %v1533_v7 = vpop.f32.mrf.mxu1  ;;  %1964 = vst.msk [vmem:[%s2687_s21 + $0x358] sm:$0xff] %vm759_vm1, %v1205_v1  ;;  %v1151_v8 = vmul.f32 3.8269808, %v1089_v2  ;;  %v1093_v9 = vpop.f32.mrf.mxu0 }
 0x339   : > { %2048 = vst [vmem:[%s2687_s21 + $0x500] sm:$0xff] %v1654_v3  ;;  %v1655_v10 = vadd.f32 -1.4802198, %v1599_v4  ;;  %v1600_v37 = vmul.f32 3.6261168, %v1533_v7 }
 0x33a   : > { %1965 = vst [vmem:[%s2687_s21 + $0x360] sm:$0xff] %v1206_v5  ;;  %v1152_v38 = vmul.f32 3.8269808, %v1093_v9  ;;  %v1535_v39 = vpop.f32.mrf.mxu1  ;;  %v1207_v42 = vadd.f32 -1.7520971, %v1151_v8  ;;  %v1095_v43 = vpop.f32.mrf.mxu0 }
 0x33b   : > { %2049 = vst.msk [vmem:[%s2687_s21 + $0x508] sm:$0xff] %vm759_vm1, %v1655_v10  ;;  %v1656_v44 = vadd.f32 -1.4802198, %v1600_v37  ;;  %v1601_v45 = vmul.f32 3.6261168, %v1535_v39 }
 0x33c   : > { %v1208_v11 = vadd.f32 -1.7520971, %v1152_v38  ;;  %v1539_v12 = vpop.f32.mrf.mxu1  ;;  %1966 = vst.msk [vmem:[%s2687_s21 + $0x368] sm:$0xff] %vm759_vm1, %v1207_v42  ;;  %v1153_v13 = vmul.f32 3.8269808, %v1095_v43 }
 0x33d   : > { %2050 = vst [vmem:[%s2687_s21 + $0x510] sm:$0xff] %v1656_v44  ;;  %v1657_v14 = vadd.f32 -1.4802198, %v1601_v45  ;;  %v1602_v15 = vmul.f32 3.6261168, %v1539_v12 }
 0x33e   : > { %1967 = vst [vmem:[%s2687_s21 + $0x370] sm:$0xff] %v1208_v11  ;;  %v1541_v16 = vpop.f32.mrf.mxu1  ;;  %v1209_v17 = vadd.f32 -1.7520971, %v1153_v13 }
 0x33f   : > { %2051 = vst.msk [vmem:[%s2687_s21 + $0x518] sm:$0xff] %vm759_vm1, %v1657_v14  ;;  %v1658_v18 = vadd.f32 -1.4802198, %v1602_v15  ;;  %v1603_v19 = vmul.f32 3.6261168, %v1541_v16 }
 0x340   : > { %v1545_v20 = vpop.f32.mrf.mxu1  ;;  %1968 = vst.msk [vmem:[%s2687_s21 + $0x378] sm:$0xff] %vm759_vm1, %v1209_v17 }
 0x341   : > { %2052 = vst [vmem:[%s2687_s21 + $0x520] sm:$0xff] %v1658_v18  ;;  %v1659_v21 = vadd.f32 -1.4802198, %v1603_v19  ;;  %v1604_v6 = vmul.f32 3.6261168, %v1545_v20 }
 0x342   : > { %v1547_v22 = vpop.f32.mrf.mxu1 }
 0x343   : > { %2053 = vst.msk [vmem:[%s2687_s21 + $0x528] sm:$0xff] %vm759_vm1, %v1659_v21  ;;  %v1660_v23 = vadd.f32 -1.4802198, %v1604_v6  ;;  %v1605_v24 = vmul.f32 3.6261168, %v1547_v22 }
 0x345   : > { %2054 = vst [vmem:[%s2687_s21 + $0x530] sm:$0xff] %v1660_v23  ;;  %v1661_v25 = vadd.f32 -1.4802198, %v1605_v24 }
 0x347   : > { %2055 = vst.msk [vmem:[%s2687_s21 + $0x538] sm:$0xff] %vm759_vm1, %v1661_v25 }
 0x348   : > { %2217 = shalt.err (!%p2214_p4)
}
 0x349   : > { %s2218_s27 = scalar_lea.hbm %s3109_s22, 21504  ;;  %s2222_s9 = scalar_lea.hbm %s3165_s3, 43008 }
 0x34a   : > { %p2219_p6 = scmp.ne.s32.totalorder %s3109_s22, %s2218_s27  ;;  %p2223_p0 = scmp.lt.s32.totalorder %s3109_s22, %s3165_s3 }
 0x34b   : > { %p2224_p3 = scmp.lt.s32.totalorder %s2222_s9, %s2218_s27 }
 0x34c   : > { %p2220_p9 = pnand %p2219_p6, %p2405_p13 }
 0x34d   : > { %p2225_p1 = por %p2224_p3, %p2223_p0 }
 0x34e   : > { %p2221_p12 = pneg %p2220_p9 }
 0x350   : > { %p2226_p8 = pnand %p2225_p1, %p2221_p12 }
 0x352   : > { %2229 = shalt.err (!%p2226_p8)
}
 0x353   : > { %s2297_s21 = smov 256   ;;  %s2298_s25 = smov 16  }
 0x354   : > { %2074 = dma.vmem_to_hbm [thread:$0]  (%p2405_p13), %s3111_s19, 21504, %s3109_s22, %s1720_s15, %s2297_s21, %s2297_s21, %s2298_s25  }
 0x355 PF: > { %s1748_s29 = sand.u32 1, %s2268_s12   ;;  %p3176_p11 = scmp.ne.s32.totalorder %s3170_s23, 0 }
 0x356   : > { %s1749_s20 = scalar_lea.sflag [#allocation5], %s1748_s29 }
 0x357   : > { %p2085_p2 = pnand %p1847_p10, %p3176_p11 }
 0x359   : > { %p2086_p5 = pneg %p2085_p2 }
 0x35b   : > { %2263 = dma.done.wait (%p2086_p5), %s1749_s20, 21504  }
 0x35c   : > { %2265 = vsyncadd (%p2086_p5), %s1749_s20, 4294945792  ;;  %s20_s17 = sadd.s32 1, %s2288_s17   ;;  %s3177_s12 = smov %s2272_s13 }
 0x35d   : > { %p17_p7 = scmp.ge.s32.totalorder %s20_s17, 4   ;;  %s3178_s13 = smov %s2276_s14 }
 0x35e   : > { %s3179_s14 = smov %s2414_s18  ;;  %s3180_s15 = smov %s2284_s16 }
 0x35f   : > { %s3181_s16 = smov %s3183_s28  ;;  %19 = sbr.rel (!%p17_p7) target bundleno = 7 (0x7), region = 88 }
 0x364   :  { %1754 = vsyncpa [#allocation4], 1 }
 0x365   :  { %1756 = vsyncpa [#allocation4 + $0x1], 1 }
 0x366   :  { %1757 = vsyncpa [#allocation7], 1 }
 0x367   :  { %1758 = vsyncpa [#allocation5], 1 }
 0x368   :  { %1760 = vsyncpa [#allocation5 + $0x1], 1 }

</bundles_post_ra>
